<compile_context>
chip_gen: v5e
topology: v5e:2x2
jax: 0.10.0
libtpu: 0.0.40
codegen_flags: <defaults>
</compile_context>

<pallas_src>
import math

import jax
import jax.numpy as jnp
import numpy as np
from jax.experimental import pallas as pl
from jax.experimental.pallas import tpu as pltpu

LANE = 128       # vreg lane width
MIN_TILE = 256   # MXU-aligned; satisfies bf16 (16,128) min tile


def _round_up(v, m):
    return (v + m - 1) // m * m


def _pad2d(x, rows, cols):
    r, c = x.shape
    return jnp.pad(x, ((0, rows - r), (0, cols - c)))


def _row_dim_semantic(num_row_tiles):
    """CORE_PARALLEL on v7x (2 TensorCores) so row tiles split across cores;
    plain PARALLEL on single-TC chips (v5e/v6e).  Detection is best-effort."""
    try:
        kind = jax.devices()[0].device_kind.lower()
        is_v7 = any(tag in kind for tag in ("v7", "tpu7", "7x"))
    except Exception:
        is_v7 = False
    if is_v7 and num_row_tiles >= 2:
        return getattr(pltpu, "CORE_PARALLEL", pltpu.PARALLEL)
    return pltpu.PARALLEL


# --------------------------------------------------------------------------
# Kernels
# --------------------------------------------------------------------------
def project_kernel(x_ref, w_ref, o_ref):
    """XW = X @ W1 (row-tiled; tiny W1 resident across the grid)."""
    o_ref[...] = jnp.dot(
        x_ref[...], w_ref[...], preferred_element_type=jnp.float32
    ).astype(o_ref.dtype)


def make_propagate_project_kernel(tk, m_resident):
    """Layer 1 + fused layer-2 projection: HW = relu(A_hat @ XW + b1) @ W2."""

    def kernel(a_ref, m_ref, b_ref, w_ref, o_ref, acc_ref):
        k = pl.program_id(1)

        @pl.when(k == 0)
        def _():
            acc_ref[...] = jnp.zeros_like(acc_ref)

        if m_resident:
            # XW is fully VMEM-resident; slice the K chunk in-kernel.
            start = pl.multiple_of(k * tk, tk)
            m = m_ref[pl.ds(start, tk), :]
        else:
            m = m_ref[...]
        acc_ref[...] += jnp.dot(a_ref[...], m, preferred_element_type=jnp.float32)

        @pl.when(k == pl.num_programs(1) - 1)
        def _():
            # NOTE: padded rows of A_hat are zero -> acc is zero there ->
            # h = relu(b1) on padded rows, i.e. HW has NONZERO padded rows.
            # This stays exact only because layer 2 multiplies by A_hat whose
            # padded COLUMNS are zero and the output is sliced to (n, out_c).
            # Do not reuse HW's padded rows elsewhere.
            h = jnp.maximum(acc_ref[...] + b_ref[...], 0.0).astype(jnp.bfloat16)
            o_ref[...] = jnp.dot(
                h, w_ref[...], preferred_element_type=jnp.float32
            ).astype(o_ref.dtype)

    return kernel


def make_propagate_kernel(tk, m_resident):
    """Layer 2 propagation: O = A_hat @ HW + b2 (accumulate into f32 output)."""

    def kernel(a_ref, m_ref, b_ref, o_ref):
        k = pl.program_id(1)

        @pl.when(k == 0)
        def _():
            # Fold +b2 into init; the f32 output block is the accumulator
            # (its block index is constant in k -> VMEM-resident).
            o_ref[...] = jnp.zeros_like(o_ref) + b_ref[...]

        if m_resident:
            start = pl.multiple_of(k * tk, tk)
            m = m_ref[pl.ds(start, tk), :]
        else:
            m = m_ref[...]
        o_ref[...] += jnp.dot(a_ref[...], m, preferred_element_type=jnp.float32)

    return kernel


# --------------------------------------------------------------------------
# Wrapper
# --------------------------------------------------------------------------
def gcn_forward(a_hat, x, w1, b1, w2, b2, *, tm=1024, tk=512,
                resident_budget_bytes=4 << 20):
    """GCNClassifier forward: relu(GCNConv1) -> GCNConv2, on dense A_hat."""
    n, in_c = x.shape
    hid_c = w1.shape[1]
    out_c = w2.shape[1]

    # Clamp tiles for small graphs; both stay multiples of 256.
    tm = max(MIN_TILE, min(tm, _round_up(n, MIN_TILE)))
    tk = max(MIN_TILE, min(tk, _round_up(n, MIN_TILE)))
    n_p = _round_up(n, math.lcm(tm, tk))
    cin_p = _round_up(in_c, LANE)
    chid_p = _round_up(hid_c, LANE)
    cout_p = _round_up(out_c, LANE)
    gm, gk = n_p // tm, n_p // tk

    # Zero padding is exact for all matmuls; padded rows/cols are sliced off.
    # Cast BEFORE padding so no padded f32 N_p x N_p intermediate is built.
    a_p = _pad2d(a_hat.astype(jnp.bfloat16), n_p, n_p)
    x_p = _pad2d(x.astype(jnp.bfloat16), n_p, cin_p)
    w1_p = _pad2d(w1.astype(jnp.bfloat16), cin_p, chid_p)
    b1_p = _pad2d(b1.astype(jnp.float32), 1, chid_p)
    w2_p = _pad2d(w2.astype(jnp.bfloat16), chid_p, cout_p)
    b2_p = _pad2d(b2.astype(jnp.float32), 1, cout_p)

    row_sem = _row_dim_semantic(gm)

    # ---- XW = X @ W1 (tiny projection, kept out of the K loop) ----
    xw = pl.pallas_call(
        project_kernel,
        out_shape=jax.ShapeDtypeStruct((n_p, chid_p), jnp.bfloat16),
        grid_spec=pltpu.PrefetchScalarGridSpec(
            num_scalar_prefetch=0,
            grid=(gm,),
            in_specs=[
                pl.BlockSpec((tm, cin_p), lambda i: (i, 0)),
                pl.BlockSpec((cin_p, chid_p), lambda i: (0, 0)),  # resident
            ],
            out_specs=pl.BlockSpec((tm, chid_p), lambda i: (i, 0)),
        ),
        compiler_params=pltpu.CompilerParams(dimension_semantics=(row_sem,)),
    )(x_p, w1_p)

    # XW / HW: fully VMEM-resident (one DMA per kernel) when they fit the
    # budget; otherwise stream a (TK, C) slab per reduction step.
    xw_resident = n_p * chid_p * 2 <= resident_budget_bytes
    hw_resident = n_p * cout_p * 2 <= resident_budget_bytes

    xw_spec = (pl.BlockSpec((n_p, chid_p), lambda i, k: (0, 0)) if xw_resident
               else pl.BlockSpec((tk, chid_p), lambda i, k: (k, 0)))

    # ---- HW = relu(A_hat @ XW + b1) @ W2 (layer 1 + fused projection) ----
    hw = pl.pallas_call(
        make_propagate_project_kernel(tk, xw_resident),
        out_shape=jax.ShapeDtypeStruct((n_p, cout_p), jnp.bfloat16),
        grid_spec=pltpu.PrefetchScalarGridSpec(
            num_scalar_prefetch=0,
            grid=(gm, gk),
            in_specs=[
                pl.BlockSpec((tm, tk), lambda i, k: (i, k)),      # A tile
                xw_spec,                                          # XW
                pl.BlockSpec((1, chid_p), lambda i, k: (0, 0)),   # b1 resident
                pl.BlockSpec((chid_p, cout_p), lambda i, k: (0, 0)),  # W2 resident
            ],
            out_specs=pl.BlockSpec((tm, cout_p), lambda i, k: (i, 0)),
            scratch_shapes=[pltpu.VMEM((tm, chid_p), jnp.float32)],
        ),
        compiler_params=pltpu.CompilerParams(
            dimension_semantics=(row_sem, pltpu.ARBITRARY)),
    )(a_p, xw, b1_p, w2_p)

    hw_spec = (pl.BlockSpec((n_p, cout_p), lambda i, k: (0, 0)) if hw_resident
               else pl.BlockSpec((tk, cout_p), lambda i, k: (k, 0)))

    # ---- O = A_hat @ HW + b2 (layer 2 propagation, acc in f32 output) ----
    out_p = pl.pallas_call(
        make_propagate_kernel(tk, hw_resident),
        out_shape=jax.ShapeDtypeStruct((n_p, cout_p), jnp.float32),
        grid_spec=pltpu.PrefetchScalarGridSpec(
            num_scalar_prefetch=0,
            grid=(gm, gk),
            in_specs=[
                pl.BlockSpec((tm, tk), lambda i, k: (i, k)),     # A tile
                hw_spec,                                         # HW
                pl.BlockSpec((1, cout_p), lambda i, k: (0, 0)),  # b2 resident
            ],
            out_specs=pl.BlockSpec((tm, cout_p), lambda i, k: (i, 0)),
        ),
        compiler_params=pltpu.CompilerParams(
            dimension_semantics=(row_sem, pltpu.ARBITRARY)),
    )(a_p, hw, b2_p)

    return out_p[:n, :out_c]


# --------------------------------------------------------------------------
# Graph glue + reference
# --------------------------------------------------------------------------
def normalized_adjacency(edge_index, num_nodes):
    """Dense A_hat = D^{-1/2} (A + I) D^{-1/2} from a (2, E) edge_index.
    Duplicate edges scatter-add, matching PyG's gcn_norm."""
    src, dst = edge_index[0], edge_index[1]
    a = jnp.zeros((num_nodes, num_nodes), jnp.float32)
    a = a.at[dst, src].add(1.0)  # message flows source -> target
    a = a + jnp.eye(num_nodes, dtype=jnp.float32)  # self-loops
    deg = a.sum(axis=1)
    d_inv_sqrt = jnp.where(deg > 0, 1.0 / jnp.sqrt(deg), 0.0)
    return d_inv_sqrt[:, None] * a * d_inv_sqrt[None, :]


def glorot(key, shape):
    fan_in, fan_out = shape
    limit = float(np.sqrt(6.0 / (fan_in + fan_out)))
    return jax.random.uniform(key, shape, jnp.float32, -limit, limit)


def reference_forward(a_hat, x, w1, b1, w2, b2):
    h = jnp.maximum(a_hat @ (x @ w1) + b1, 0.0)
    return a_hat @ (h @ w2) + b2


if __name__ == "__main__":
    # Small synthetic graph: 16 nodes, ring + a few chords (undirected ->
    # edge_index holds both directions, like a typical PyG graph).
    N, IN_C, HID_C, OUT_C = 16, 8, 32, 4

    undirected = [(i, (i + 1) % N) for i in range(N)] + [(0, 8), (3, 11), (5, 13)]
    edges = undirected + [(b, a) for (a, b) in undirected]
    edge_index = jnp.array(np.array(edges, dtype=np.int32).T)  # (2, E)

    key = jax.random.PRNGKey(0)
    kx, kw1, kb1, kw2, kb2 = jax.random.split(key, 5)

    x = jax.random.normal(kx, (N, IN_C), jnp.float32)  # data.x
    w1 = glorot(kw1, (IN_C, HID_C))
    b1 = jax.random.normal(kb1, (1, HID_C), jnp.float32) * 0.1
    w2 = glorot(kw2, (HID_C, OUT_C))
    b2 = jax.random.normal(kb2, (1, OUT_C), jnp.float32) * 0.1

    a_hat = normalized_adjacency(edge_index, N)

    out = jax.jit(gcn_forward)(a_hat, x, w1, b1, w2, b2)
    out = jax.block_until_ready(out)

    # f32 reference; kernel uses bf16 A_hat / X / W / intermediates with f32
    # accumulation, so compare with a bf16-appropriate tolerance.
    ref = reference_forward(a_hat, x, w1, b1, w2, b2)
    np.testing.assert_allclose(np.asarray(out), np.asarray(ref), rtol=5e-2, atol=5e-2)

    print("KERNEL_OK")
</pallas_src>

<mosaic_0001>
module attributes {stable_mosaic.version = 11 : i64} {
  func.func @project_kernel(%arg0: i32, %arg1: memref<256x128xbf16, #tpu.memory_space<vmem>>, %arg2: memref<128x128xbf16, #tpu.memory_space<vmem>>, %arg3: memref<256x128xbf16, #tpu.memory_space<vmem>>) attributes {dimension_semantics = [#tpu.dimension_semantics<parallel>], iteration_bounds = array<i64: 1>, scalar_prefetch = 0 : i64, scratch_operands = 0 : i64, tpu.core_type = #tpu.core_type<tc>, window_params = [{transform_indices = @transform_0, window_bounds = array<i64: 256, 128>}, {pipeline_mode = #tpu.pipeline_mode<synchronous>, transform_indices = @transform_1, window_bounds = array<i64: 128, 128>}, {transform_indices = @transform_2, window_bounds = array<i64: 256, 128>}]} {
    %c0 = arith.constant 0 : index
    %c0_0 = arith.constant 0 : index
    %0 = vector.load %arg1[%c0, %c0_0] : memref<256x128xbf16, #tpu.memory_space<vmem>>, vector<256x128xbf16>
    %c0_1 = arith.constant 0 : index
    %c0_2 = arith.constant 0 : index
    %1 = vector.load %arg2[%c0_1, %c0_2] : memref<128x128xbf16, #tpu.memory_space<vmem>>, vector<128x128xbf16>
    %cst = arith.constant dense<0.000000e+00> : vector<256x128xf32>
    %2 = tpu.matmul %0, %1, %cst {dimension_numbers = #tpu.dot_dimension_numbers<[1], [0], [0], [1], [0, 0, 1, 1], [], []>} : vector<256x128xbf16>, vector<128x128xbf16>, vector<256x128xf32> -> vector<256x128xf32>
    %3 = arith.truncf %2 : vector<256x128xf32> to vector<256x128xbf16>
    %c0_3 = arith.constant 0 : index
    %c0_4 = arith.constant 0 : index
    %4 = vector.load %arg3[%c0_3, %c0_4] : memref<256x128xbf16, #tpu.memory_space<vmem>>, vector<256x128xbf16>
    tpu.vector_store %arg3[%c0_3, %c0_4], %3 {strides = array<i32>} : memref<256x128xbf16, #tpu.memory_space<vmem>>, vector<256x128xbf16>,
    return
  }
  func.func @transform_0(%arg0: i32) -> (i32, i32) {
    %c0_i32 = arith.constant 0 : i32
    %c0_i32_0 = arith.constant 0 : i32
    return %arg0, %c0_i32 : i32, i32
  }
  func.func @transform_1(%arg0: i32) -> (i32, i32) {
    %c0_i32 = arith.constant 0 : i32
    %c0_i32_0 = arith.constant 0 : i32
    %c0_i32_1 = arith.constant 0 : i32
    return %c0_i32, %c0_i32_0 : i32, i32
  }
  func.func @transform_2(%arg0: i32) -> (i32, i32) {
    %c0_i32 = arith.constant 0 : i32
    %c0_i32_0 = arith.constant 0 : i32
    return %arg0, %c0_i32 : i32, i32
  }
}

module attributes {stable_mosaic.version = 11 : i64} {
  func.func @kernel(%arg0: i32, %arg1: i32, %arg2: memref<256x256xbf16, #tpu.memory_space<vmem>>, %arg3: memref<256x128xbf16, #tpu.memory_space<vmem>>, %arg4: memref<1x128xf32, #tpu.memory_space<vmem>>, %arg5: memref<256x128xf32, #tpu.memory_space<vmem>>) attributes {dimension_semantics = [#tpu.dimension_semantics<parallel>, #tpu.dimension_semantics<arbitrary>], iteration_bounds = array<i64: 1, 1>, scalar_prefetch = 0 : i64, scratch_operands = 0 : i64, tpu.core_type = #tpu.core_type<tc>, window_params = [{transform_indices = @transform_0, window_bounds = array<i64: 256, 256>}, {pipeline_mode = #tpu.pipeline_mode<synchronous>, transform_indices = @transform_1, window_bounds = array<i64: 256, 128>}, {pipeline_mode = #tpu.pipeline_mode<synchronous>, transform_indices = @transform_2, window_bounds = array<i64: 1, 128>}, {transform_indices = @transform_3, window_bounds = array<i64: 256, 128>}]} {
    %c0_i32 = arith.constant 0 : i32
    %0 = arith.cmpi eq, %arg1, %c0_i32 : i32
    %1 = arith.extui %0 : i1 to i32
    %c0_i32_0 = arith.constant 0 : i32
    %2 = arith.cmpi ne, %1, %c0_i32_0 : i32
    scf.if %2 {
      %cst_7 = arith.constant 0.000000e+00 : f32
      %12 = vector.broadcast %cst_7 : f32 to vector<256x128xf32>
      %c0_8 = arith.constant 0 : index
      %c0_9 = arith.constant 0 : index
      %13 = vector.load %arg4[%c0_8, %c0_9] : memref<1x128xf32, #tpu.memory_space<vmem>>, vector<1x128xf32>
      %14 = vector.broadcast %13 : vector<1x128xf32> to vector<256x128xf32>
      %15 = arith.addf %12, %14 : vector<256x128xf32>
      %c0_10 = arith.constant 0 : index
      %c0_11 = arith.constant 0 : index
      %16 = vector.load %arg5[%c0_10, %c0_11] : memref<256x128xf32, #tpu.memory_space<vmem>>, vector<256x128xf32>
      tpu.vector_store %arg5[%c0_10, %c0_11], %15 {strides = array<i32>} : memref<256x128xf32, #tpu.memory_space<vmem>>, vector<256x128xf32>,
    } else {
    }
    %c256_i32 = arith.constant 256 : i32
    %3 = arith.muli %arg1, %c256_i32 : i32
    %4 = tpu.assume_multiple %3, 256 : i32
    %5 = arith.index_cast %4 : i32 to index
    %c0 = arith.constant 0 : index
    %6 = vector.load %arg3[%5, %c0] : memref<256x128xbf16, #tpu.memory_space<vmem>>, vector<256x128xbf16>
    %c0_1 = arith.constant 0 : index
    %c0_2 = arith.constant 0 : index
    %7 = vector.load %arg5[%c0_1, %c0_2] : memref<256x128xf32, #tpu.memory_space<vmem>>, vector<256x128xf32>
    %c0_3 = arith.constant 0 : index
    %c0_4 = arith.constant 0 : index
    %8 = vector.load %arg2[%c0_3, %c0_4] : memref<256x256xbf16, #tpu.memory_space<vmem>>, vector<256x256xbf16>
    %cst = arith.constant dense<0.000000e+00> : vector<256x128xf32>
    %9 = tpu.matmul %8, %6, %cst {dimension_numbers = #tpu.dot_dimension_numbers<[1], [0], [0], [1], [0, 0, 1, 1], [], []>} : vector<256x256xbf16>, vector<256x128xbf16>, vector<256x128xf32> -> vector<256x128xf32>
    %10 = arith.addf %7, %9 : vector<256x128xf32>
    %c0_5 = arith.constant 0 : index
    %c0_6 = arith.constant 0 : index
    %11 = vector.load %arg5[%c0_5, %c0_6] : memref<256x128xf32, #tpu.memory_space<vmem>>, vector<256x128xf32>
    tpu.vector_store %arg5[%c0_5, %c0_6], %10 {strides = array<i32>} : memref<256x128xf32, #tpu.memory_space<vmem>>, vector<256x128xf32>,
    return
  }
  func.func @transform_0(%arg0: i32, %arg1: i32) -> (i32, i32) {
    %c0_i32 = arith.constant 0 : i32
    return %arg0, %arg1 : i32, i32
  }
  func.func @transform_1(%arg0: i32, %arg1: i32) -> (i32, i32) {
    %c0_i32 = arith.constant 0 : i32
    %c0_i32_0 = arith.constant 0 : i32
    %c0_i32_1 = arith.constant 0 : i32
    return %c0_i32, %c0_i32_0 : i32, i32
  }
  func.func @transform_2(%arg0: i32, %arg1: i32) -> (i32, i32) {
    %c0_i32 = arith.constant 0 : i32
    %c0_i32_0 = arith.constant 0 : i32
    %c0_i32_1 = arith.constant 0 : i32
    return %c0_i32, %c0_i32_0 : i32, i32
  }
  func.func @transform_3(%arg0: i32, %arg1: i32) -> (i32, i32) {
    %c0_i32 = arith.constant 0 : i32
    %c0_i32_0 = arith.constant 0 : i32
    return %arg0, %c0_i32 : i32, i32
  }
}

module attributes {stable_mosaic.version = 11 : i64} {
  func.func @kernel(%arg0: i32, %arg1: i32, %arg2: memref<256x256xbf16, #tpu.memory_space<vmem>>, %arg3: memref<256x128xbf16, #tpu.memory_space<vmem>>, %arg4: memref<1x128xf32, #tpu.memory_space<vmem>>, %arg5: memref<128x128xbf16, #tpu.memory_space<vmem>>, %arg6: memref<256x128xbf16, #tpu.memory_space<vmem>>, %arg7: memref<256x128xf32, #tpu.memory_space<vmem>>) attributes {dimension_semantics = [#tpu.dimension_semantics<parallel>, #tpu.dimension_semantics<arbitrary>], iteration_bounds = array<i64: 1, 1>, scalar_prefetch = 0 : i64, scratch_operands = 1 : i64, tpu.core_type = #tpu.core_type<tc>, window_params = [{transform_indices = @transform_0, window_bounds = array<i64: 256, 256>}, {pipeline_mode = #tpu.pipeline_mode<synchronous>, transform_indices = @transform_1, window_bounds = array<i64: 256, 128>}, {pipeline_mode = #tpu.pipeline_mode<synchronous>, transform_indices = @transform_2, window_bounds = array<i64: 1, 128>}, {pipeline_mode = #tpu.pipeline_mode<synchronous>, transform_indices = @transform_3, window_bounds = array<i64: 128, 128>}, {transform_indices = @transform_4, window_bounds = array<i64: 256, 128>}]} {
    %c0_i32 = arith.constant 0 : i32
    %0 = arith.cmpi eq, %arg1, %c0_i32 : i32
    %1 = arith.extui %0 : i1 to i32
    %c0_i32_0 = arith.constant 0 : i32
    %2 = arith.cmpi ne, %1, %c0_i32_0 : i32
    scf.if %2 {
      %cst_9 = arith.constant 0.000000e+00 : f32
      %15 = vector.broadcast %cst_9 : f32 to vector<256x128xf32>
      %c0_10 = arith.constant 0 : index
      %c0_11 = arith.constant 0 : index
      %16 = vector.load %arg7[%c0_10, %c0_11] : memref<256x128xf32, #tpu.memory_space<vmem>>, vector<256x128xf32>
      tpu.vector_store %arg7[%c0_10, %c0_11], %15 {strides = array<i32>} : memref<256x128xf32, #tpu.memory_space<vmem>>, vector<256x128xf32>,
    } else {
    }
    %c256_i32 = arith.constant 256 : i32
    %3 = arith.muli %arg1, %c256_i32 : i32
    %4 = tpu.assume_multiple %3, 256 : i32
    %5 = arith.index_cast %4 : i32 to index
    %c0 = arith.constant 0 : index
    %6 = vector.load %arg3[%5, %c0] : memref<256x128xbf16, #tpu.memory_space<vmem>>, vector<256x128xbf16>
    %c0_1 = arith.constant 0 : index
    %c0_2 = arith.constant 0 : index
    %7 = vector.load %arg7[%c0_1, %c0_2] : memref<256x128xf32, #tpu.memory_space<vmem>>, vector<256x128xf32>
    %c0_3 = arith.constant 0 : index
    %c0_4 = arith.constant 0 : index
    %8 = vector.load %arg2[%c0_3, %c0_4] : memref<256x256xbf16, #tpu.memory_space<vmem>>, vector<256x256xbf16>
    %cst = arith.constant dense<0.000000e+00> : vector<256x128xf32>
    %9 = tpu.matmul %8, %6, %cst {dimension_numbers = #tpu.dot_dimension_numbers<[1], [0], [0], [1], [0, 0, 1, 1], [], []>} : vector<256x256xbf16>, vector<256x128xbf16>, vector<256x128xf32> -> vector<256x128xf32>
    %10 = arith.addf %7, %9 : vector<256x128xf32>
    %c0_5 = arith.constant 0 : index
    %c0_6 = arith.constant 0 : index
    %11 = vector.load %arg7[%c0_5, %c0_6] : memref<256x128xf32, #tpu.memory_space<vmem>>, vector<256x128xf32>
    tpu.vector_store %arg7[%c0_5, %c0_6], %10 {strides = array<i32>} : memref<256x128xf32, #tpu.memory_space<vmem>>, vector<256x128xf32>,
    %c0_i32_7 = arith.constant 0 : i32
    %12 = arith.cmpi eq, %arg1, %c0_i32_7 : i32
    %13 = arith.extui %12 : i1 to i32
    %c0_i32_8 = arith.constant 0 : i32
    %14 = arith.cmpi ne, %13, %c0_i32_8 : i32
    scf.if %14 {
      %c0_9 = arith.constant 0 : index
      %c0_10 = arith.constant 0 : index
      %15 = vector.load %arg7[%c0_9, %c0_10] : memref<256x128xf32, #tpu.memory_space<vmem>>, vector<256x128xf32>
      %c0_11 = arith.constant 0 : index
      %c0_12 = arith.constant 0 : index
      %16 = vector.load %arg4[%c0_11, %c0_12] : memref<1x128xf32, #tpu.memory_space<vmem>>, vector<1x128xf32>
      %17 = vector.broadcast %16 : vector<1x128xf32> to vector<256x128xf32>
      %18 = arith.addf %15, %17 : vector<256x128xf32>
      %cst_13 = arith.constant 0.000000e+00 : f32
      %19 = vector.broadcast %cst_13 : f32 to vector<256x128xf32>
      %20 = arith.maximumf %18, %19 : vector<256x128xf32>
      %21 = arith.truncf %20 : vector<256x128xf32> to vector<256x128xbf16>
      %c0_14 = arith.constant 0 : index
      %c0_15 = arith.constant 0 : index
      %22 = vector.load %arg5[%c0_14, %c0_15] : memref<128x128xbf16, #tpu.memory_space<vmem>>, vector<128x128xbf16>
      %cst_16 = arith.constant dense<0.000000e+00> : vector<256x128xf32>
      %23 = tpu.matmul %21, %22, %cst_16 {dimension_numbers = #tpu.dot_dimension_numbers<[1], [0], [0], [1], [0, 0, 1, 1], [], []>} : vector<256x128xbf16>, vector<128x128xbf16>, vector<256x128xf32> -> vector<256x128xf32>
      %24 = arith.truncf %23 : vector<256x128xf32> to vector<256x128xbf16>
      %c0_17 = arith.constant 0 : index
      %c0_18 = arith.constant 0 : index
      %25 = vector.load %arg6[%c0_17, %c0_18] : memref<256x128xbf16, #tpu.memory_space<vmem>>, vector<256x128xbf16>
      tpu.vector_store %arg6[%c0_17, %c0_18], %24 {strides = array<i32>} : memref<256x128xbf16, #tpu.memory_space<vmem>>, vector<256x128xbf16>,
    } else {
    }
    return
  }
  func.func @transform_0(%arg0: i32, %arg1: i32) -> (i32, i32) {
    %c0_i32 = arith.constant 0 : i32
    return %arg0, %arg1 : i32, i32
  }
  func.func @transform_1(%arg0: i32, %arg1: i32) -> (i32, i32) {
    %c0_i32 = arith.constant 0 : i32
    %c0_i32_0 = arith.constant 0 : i32
    %c0_i32_1 = arith.constant 0 : i32
    return %c0_i32, %c0_i32_0 : i32, i32
  }
  func.func @transform_2(%arg0: i32, %arg1: i32) -> (i32, i32) {
    %c0_i32 = arith.constant 0 : i32
    %c0_i32_0 = arith.constant 0 : i32
    %c0_i32_1 = arith.constant 0 : i32
    return %c0_i32, %c0_i32_0 : i32, i32
  }
  func.func @transform_3(%arg0: i32, %arg1: i32) -> (i32, i32) {
    %c0_i32 = arith.constant 0 : i32
    %c0_i32_0 = arith.constant 0 : i32
    %c0_i32_1 = arith.constant 0 : i32
    return %c0_i32, %c0_i32_0 : i32, i32
  }
  func.func @transform_4(%arg0: i32, %arg1: i32) -> (i32, i32) {
    %c0_i32 = arith.constant 0 : i32
    %c0_i32_0 = arith.constant 0 : i32
    return %arg0, %c0_i32 : i32, i32
  }
}

</mosaic_0001>

<bundles_post_ra>
// kernel: gcn_forward.3
= control target key start
LH: loop header
LB: loop body
LE: loop exit
PB: predicated region body
PF: predicated region fallthrough
CT: control target
= control target key end

     0   :  { %s734_s1 = inlined_call_operand.vmem [shape: bf16[128,128], index: 1, kind: input, shape index: {}]   ;;  %s735_s0 = inlined_call_operand.vmem [shape: bf16[256,128], index: 0, kind: input, shape index: {}]   ;;  %s736_s2 = inlined_call_operand.vmem [shape: bf16[256,128], index: 2, kind: output, shape index: {}]  }
   0x1   :  { %v479_v0 = vld [vmem:[%s734_s1 + $0x38] sm:$0xff]  ;;  %v478_v1 = vld [vmem:[%s734_s1 + $0x30] sm:$0xff]  ;;  %v477_v2 = vld [vmem:[%s734_s1 + $0x28] sm:$0xff] }
   0x2   :  { %203 = vmatpush.bf16.msra.mxu0 %v479_v0  ;;  %575 = vmatpush.bf16.msra.mxu1 %v479_v0  ;;  %v476_v3 = vld [vmem:[%s734_s1 + $0x20] sm:$0xff]  ;;  %v475_v4 = vld [vmem:[%s734_s1 + $0x18] sm:$0xff]  ;;  %v474_v5 = vld [vmem:[%s734_s1 + $0x10] sm:$0xff] }
   0x3   :  { %576 = vmatpush.bf16.msra.mxu2 %v479_v0  ;;  %577 = vmatpush.bf16.msra.mxu3 %v479_v0  ;;  %v473_v6 = vld [vmem:[%s734_s1 + $0x8] sm:$0xff]  ;;  %v472_v7 = vld [vmem:[%s734_s1] sm:$0xff]  ;;  %v458_v16 = vld [vmem:[%s735_s0 + $0x10] sm:$0xff] }
   0x4   :  { %v456_v8 = vld [vmem:[%s735_s0] sm:$0xff]  ;;  %v457_v12 = vld [vmem:[%s735_s0 + $0x8] sm:$0xff]  ;;  %v462_v17 = vld [vmem:[%s735_s0 + $0x30] sm:$0xff] }
   0x5   :  { %v460_v9 = vld [vmem:[%s735_s0 + $0x20] sm:$0xff]  ;;  %v461_v13 = vld [vmem:[%s735_s0 + $0x28] sm:$0xff]  ;;  %v466_v18 = vld [vmem:[%s735_s0 + $0x50] sm:$0xff] }
   0x6   :  { %204 = vmatpush.bf16.msra.mxu0 %v478_v1  ;;  %578 = vmatpush.bf16.msra.mxu1 %v478_v1  ;;  %v464_v10 = vld [vmem:[%s735_s0 + $0x40] sm:$0xff]  ;;  %v465_v14 = vld [vmem:[%s735_s0 + $0x48] sm:$0xff]  ;;  %v470_v19 = vld [vmem:[%s735_s0 + $0x70] sm:$0xff] }
   0x7   :  { %579 = vmatpush.bf16.msra.mxu2 %v478_v1  ;;  %580 = vmatpush.bf16.msra.mxu3 %v478_v1  ;;  %v468_v11 = vld [vmem:[%s735_s0 + $0x60] sm:$0xff]  ;;  %v469_v15 = vld [vmem:[%s735_s0 + $0x68] sm:$0xff]  ;;  %v459_v20 = vld [vmem:[%s735_s0 + $0x18] sm:$0xff] }
   0x8   :  { %v463_v21 = vld [vmem:[%s735_s0 + $0x38] sm:$0xff] }
   0x9   :  { %v467_v22 = vld [vmem:[%s735_s0 + $0x58] sm:$0xff] }
   0xa   :  { %205 = vmatpush.bf16.msra.mxu0 %v477_v2  ;;  %581 = vmatpush.bf16.msra.mxu1 %v477_v2  ;;  %v471_v23 = vld [vmem:[%s735_s0 + $0x78] sm:$0xff] }
   0xb   :  { %582 = vmatpush.bf16.msra.mxu2 %v477_v2  ;;  %583 = vmatpush.bf16.msra.mxu3 %v477_v2 }
   0xe   :  { %206 = vmatpush.bf16.msra.mxu0 %v476_v3  ;;  %584 = vmatpush.bf16.msra.mxu1 %v476_v3 }
   0xf   :  { %585 = vmatpush.bf16.msra.mxu2 %v476_v3  ;;  %586 = vmatpush.bf16.msra.mxu3 %v476_v3 }
  0x12   :  { %207 = vmatpush.bf16.msra.mxu0 %v475_v4  ;;  %587 = vmatpush.bf16.msra.mxu1 %v475_v4 }
  0x13   :  { %588 = vmatpush.bf16.msra.mxu2 %v475_v4  ;;  %589 = vmatpush.bf16.msra.mxu3 %v475_v4 }
  0x16   :  { %208 = vmatpush.bf16.msra.mxu0 %v474_v5  ;;  %590 = vmatpush.bf16.msra.mxu1 %v474_v5 }
  0x17   :  { %591 = vmatpush.bf16.msra.mxu2 %v474_v5  ;;  %592 = vmatpush.bf16.msra.mxu3 %v474_v5 }
  0x1a   :  { %209 = vmatpush.bf16.msra.mxu0 %v473_v6  ;;  %593 = vmatpush.bf16.msra.mxu1 %v473_v6 }
  0x1b   :  { %594 = vmatpush.bf16.msra.mxu2 %v473_v6  ;;  %595 = vmatpush.bf16.msra.mxu3 %v473_v6 }
  0x1e   :  { %210 = vmatpush.bf16.msra.mxu0 %v472_v7  ;;  %596 = vmatpush.bf16.msra.mxu1 %v472_v7 }
  0x1f   :  { %597 = vmatpush.bf16.msra.mxu2 %v472_v7  ;;  %598 = vmatpush.bf16.msra.mxu3 %v472_v7 }
  0x21   :  { %211 = vmatmul.bf16.vlgmr.msra.gmra.mxu0 %v456_v8  ;;  %231 = vmatmul.bf16.vlgmr.msra.gmra.mxu1 %v460_v9 }
  0x22   :  { %251 = vmatmul.bf16.vlgmr.msra.gmra.mxu2 %v464_v10  ;;  %271 = vmatmul.bf16.vlgmr.msra.gmra.mxu3 %v468_v11 }
  0x31   :  { %216 = vmatmul.bf16.gmra.mxu0 %v457_v12  ;;  %236 = vmatmul.bf16.gmra.mxu1 %v461_v13 }
  0x32   :  { %256 = vmatmul.bf16.gmra.mxu2 %v465_v14  ;;  %276 = vmatmul.bf16.gmra.mxu3 %v469_v15 }
  0x41   :  { %221 = vmatmul.bf16.gmra.mxu0 %v458_v16  ;;  %241 = vmatmul.bf16.gmra.mxu1 %v462_v17 }
  0x42   :  { %261 = vmatmul.bf16.gmra.mxu2 %v466_v18  ;;  %281 = vmatmul.bf16.gmra.mxu3 %v470_v19 }
  0x51   :  { %226 = vmatmul.bf16.gmra.mxu0 %v459_v20  ;;  %246 = vmatmul.bf16.gmra.mxu1 %v463_v21 }
  0x52   :  { %266 = vmatmul.bf16.gmra.mxu2 %v467_v22  ;;  %286 = vmatmul.bf16.gmra.mxu3 %v471_v23 }
  0x9e   :  { %v212_v24 = vpop.f32.mrf.mxu0  ;;  %v232_v25 = vpop.f32.mrf.mxu1 }
  0xa5   :  { %v252_v26 = vpop.f32.mrf.mxu2  ;;  %v272_v27 = vpop.f32.mrf.mxu3 }
  0xa6   :  { %v214_v28 = vpop.f32.mrf.mxu0  ;;  %v234_v29 = vpop.f32.mrf.mxu1 }
  0xa7   :  { %v483_v30 = vpack.c.bf16 %v214_v28, %v212_v24  ;;  %v503_v31 = vpack.c.bf16 %v234_v29, %v232_v25 }
  0xa9   :  { %484 = vst [vmem:[%s736_s2] sm:$0xff] %v483_v30  }
  0xaa   :  { %563 = vst [vmem:[%s736_s2 + $0x20] sm:$0xff] %v503_v31  }
  0xad   :  { %v254_v32 = vpop.f32.mrf.mxu2  ;;  %v274_v33 = vpop.f32.mrf.mxu3 }
  0xae   :  { %v523_v34 = vpack.c.bf16 %v254_v32, %v252_v26  ;;  %v543_v35 = vpack.c.bf16 %v274_v33, %v272_v27  ;;  %v217_v36 = vpop.f32.mrf.mxu0  ;;  %v237_v37 = vpop.f32.mrf.mxu1 }
  0xb0   :  { %567 = vst [vmem:[%s736_s2 + $0x40] sm:$0xff] %v523_v34  }
  0xb1   :  { %571 = vst [vmem:[%s736_s2 + $0x60] sm:$0xff] %v543_v35  }
  0xb5   :  { %v257_v38 = vpop.f32.mrf.mxu2  ;;  %v277_v39 = vpop.f32.mrf.mxu3 }
  0xb6   :  { %v219_v40 = vpop.f32.mrf.mxu0  ;;  %v239_v41 = vpop.f32.mrf.mxu1 }
  0xb7   :  { %v488_v42 = vpack.c.bf16 %v219_v40, %v217_v36  ;;  %v508_v43 = vpack.c.bf16 %v239_v41, %v237_v37 }
  0xb9   :  { %560 = vst [vmem:[%s736_s2 + $0x8] sm:$0xff] %v488_v42  }
  0xba   :  { %564 = vst [vmem:[%s736_s2 + $0x28] sm:$0xff] %v508_v43  }
  0xbd   :  { %v259_v44 = vpop.f32.mrf.mxu2  ;;  %v279_v45 = vpop.f32.mrf.mxu3 }
  0xbe   :  { %v528_v46 = vpack.c.bf16 %v259_v44, %v257_v38  ;;  %v548_v47 = vpack.c.bf16 %v279_v45, %v277_v39  ;;  %v222_v48 = vpop.f32.mrf.mxu0  ;;  %v242_v49 = vpop.f32.mrf.mxu1 }
  0xc0   :  { %568 = vst [vmem:[%s736_s2 + $0x48] sm:$0xff] %v528_v46  }
  0xc1   :  { %572 = vst [vmem:[%s736_s2 + $0x68] sm:$0xff] %v548_v47  }
  0xc5   :  { %v262_v50 = vpop.f32.mrf.mxu2  ;;  %v282_v51 = vpop.f32.mrf.mxu3 }
  0xc6   :  { %v224_v52 = vpop.f32.mrf.mxu0  ;;  %v244_v53 = vpop.f32.mrf.mxu1 }
  0xc7   :  { %v493_v54 = vpack.c.bf16 %v224_v52, %v222_v48  ;;  %v513_v55 = vpack.c.bf16 %v244_v53, %v242_v49 }
  0xc9   :  { %561 = vst [vmem:[%s736_s2 + $0x10] sm:$0xff] %v493_v54  }
  0xca   :  { %565 = vst [vmem:[%s736_s2 + $0x30] sm:$0xff] %v513_v55  }
  0xcd   :  { %v264_v56 = vpop.f32.mrf.mxu2  ;;  %v284_v57 = vpop.f32.mrf.mxu3 }
  0xce   :  { %v533_v58 = vpack.c.bf16 %v264_v56, %v262_v50  ;;  %v553_v59 = vpack.c.bf16 %v284_v57, %v282_v51  ;;  %v227_v60 = vpop.f32.mrf.mxu0  ;;  %v247_v61 = vpop.f32.mrf.mxu1 }
  0xd0   :  { %569 = vst [vmem:[%s736_s2 + $0x50] sm:$0xff] %v533_v58  }
  0xd1   :  { %573 = vst [vmem:[%s736_s2 + $0x70] sm:$0xff] %v553_v59  }
  0xd5   :  { %v267_v62 = vpop.f32.mrf.mxu2  ;;  %v287_v63 = vpop.f32.mrf.mxu3 }
  0xd6   :  { %v229_v0 = vpop.f32.mrf.mxu0  ;;  %v249_v1 = vpop.f32.mrf.mxu1 }
  0xd7   :  { %v498_v2 = vpack.c.bf16 %v229_v0, %v227_v60  ;;  %v518_v3 = vpack.c.bf16 %v249_v1, %v247_v61 }
  0xd9   :  { %562 = vst [vmem:[%s736_s2 + $0x18] sm:$0xff] %v498_v2  }
  0xda   :  { %566 = vst [vmem:[%s736_s2 + $0x38] sm:$0xff] %v518_v3  }
  0xdd   :  { %v269_v4 = vpop.f32.mrf.mxu2  ;;  %v289_v5 = vpop.f32.mrf.mxu3 }
  0xde   :  { %v538_v6 = vpack.c.bf16 %v269_v4, %v267_v62  ;;  %v558_v7 = vpack.c.bf16 %v289_v5, %v287_v63 }
  0xe0   :  { %570 = vst [vmem:[%s736_s2 + $0x58] sm:$0xff] %v538_v6  }
  0xe1   :  { %574 = vst [vmem:[%s736_s2 + $0x78] sm:$0xff] %v558_v7  }

// kernel: gcn_forward.5
= control target key start
LH: loop header
LB: loop body
LE: loop exit
PB: predicated region body
PF: predicated region fallthrough
CT: control target
= control target key end

     0   :  { %s1310_s1 = inlined_call_operand.vmem [shape: bf16[256,128], index: 1, kind: input, shape index: {}]   ;;  %s1311_s0 = inlined_call_operand.vmem [shape: bf16[256,256], index: 0, kind: input, shape index: {}]   ;;  %s1312_s2 = inlined_call_operand.vmem [shape: f32[1,128], index: 2, kind: input, shape index: {}]   ;;  %s1313_s3 = inlined_call_operand.vmem [shape: f32[256,128], index: 3, kind: output, shape index: {}]  }
   0x1   :  { %v859_v0 = vld [vmem:[%s1310_s1 + $0x38] sm:$0xff]  ;;  %v858_v2 = vld [vmem:[%s1310_s1 + $0x30] sm:$0xff]  ;;  %v857_v4 = vld [vmem:[%s1310_s1 + $0x28] sm:$0xff] }
   0x2   :  { %v867_v1 = vld [vmem:[%s1310_s1 + $0x78] sm:$0xff]  ;;  %412 = vmatpush.bf16.msra.mxu0 %v859_v0  ;;  %900 = vmatpush.bf16.msra.mxu2 %v859_v0  ;;  %v866_v3 = vld [vmem:[%s1310_s1 + $0x70] sm:$0xff]  ;;  %v865_v5 = vld [vmem:[%s1310_s1 + $0x68] sm:$0xff] }
   0x3   :  { %501 = vmatpush.bf16.msra.mxu1 %v867_v1  ;;  %908 = vmatpush.bf16.msra.mxu3 %v867_v1  ;;  %v856_v6 = vld [vmem:[%s1310_s1 + $0x20] sm:$0xff]  ;;  %v855_v8 = vld [vmem:[%s1310_s1 + $0x18] sm:$0xff]  ;;  %v854_v10 = vld [vmem:[%s1310_s1 + $0x10] sm:$0xff] }
   0x4   :  { %v864_v7 = vld [vmem:[%s1310_s1 + $0x60] sm:$0xff]  ;;  %v863_v9 = vld [vmem:[%s1310_s1 + $0x58] sm:$0xff]  ;;  %v862_v11 = vld [vmem:[%s1310_s1 + $0x50] sm:$0xff] }
   0x5   :  { %v853_v12 = vld [vmem:[%s1310_s1 + $0x8] sm:$0xff]  ;;  %v852_v14 = vld [vmem:[%s1310_s1] sm:$0xff]  ;;  %v670_v28 = vld [vmem:[%s1311_s0 + $0x10] sm:$0xf] }
   0x6   :  { %413 = vmatpush.bf16.msra.mxu0 %v858_v2  ;;  %901 = vmatpush.bf16.msra.mxu2 %v858_v2  ;;  %v861_v13 = vld [vmem:[%s1310_s1 + $0x48] sm:$0xff]  ;;  %v860_v15 = vld [vmem:[%s1310_s1 + $0x40] sm:$0xff]  ;;  %v871_v29 = vld [vmem:[%s1311_s0 + $0x14] sm:$0xf0] }
   0x7   :  { %502 = vmatpush.bf16.msra.mxu1 %v866_v3  ;;  %909 = vmatpush.bf16.msra.mxu3 %v866_v3  ;;  %v662_v16 = vld [vmem:[%s1311_s0] sm:$0xf]  ;;  %v869_v17 = vld [vmem:[%s1311_s0 + $0x4] sm:$0xf0]  ;;  %v868_v20 = vld [vmem:[%s1311_s0 + $0x4] sm:$0xf]  ;;  %v671_v36 = vor.u32 %v871_v29, %v670_v28 }
   0x8   :  { %v726_v18 = vld [vmem:[%s1311_s0 + $0x80] sm:$0xf]  ;;  %v885_v19 = vld [vmem:[%s1311_s0 + $0x84] sm:$0xf0]  ;;  %v664_v21 = vld [vmem:[%s1311_s0 + $0x8] sm:$0xf0]  ;;  %v663_v24 = vor.u32 %v869_v17, %v662_v16 }
   0x9   :  { %v884_v22 = vld [vmem:[%s1311_s0 + $0x84] sm:$0xf]  ;;  %v728_v23 = vld [vmem:[%s1311_s0 + $0x88] sm:$0xf0]  ;;  %v727_v25 = vor.u32 %v885_v19, %v726_v18  ;;  %v667_v26 = vor.u32 %v868_v20, %v664_v21  ;;  %v734_v30 = vld [vmem:[%s1311_s0 + $0x90] sm:$0xf] }
   0xa   :  { %414 = vmatpush.bf16.msra.mxu0 %v857_v4  ;;  %902 = vmatpush.bf16.msra.mxu2 %v857_v4  ;;  %v731_v27 = vor.u32 %v884_v22, %v728_v23  ;;  %v887_v31 = vld [vmem:[%s1311_s0 + $0x94] sm:$0xf0]  ;;  %v870_v32 = vld [vmem:[%s1311_s0 + $0x14] sm:$0xf]  ;;  %v672_v33 = vld [vmem:[%s1311_s0 + $0x18] sm:$0xf0] }
   0xb   :  { %503 = vmatpush.bf16.msra.mxu1 %v865_v5  ;;  %910 = vmatpush.bf16.msra.mxu3 %v865_v5  ;;  %v886_v34 = vld [vmem:[%s1311_s0 + $0x94] sm:$0xf]  ;;  %v736_v35 = vld [vmem:[%s1311_s0 + $0x98] sm:$0xf0]  ;;  %v735_v37 = vor.u32 %v887_v31, %v734_v30  ;;  %v675_v38 = vor.u32 %v870_v32, %v672_v33  ;;  %v678_v40 = vld [vmem:[%s1311_s0 + $0x20] sm:$0xf] }
   0xc   :  { %v739_v39 = vor.u32 %v886_v34, %v736_v35  ;;  %v873_v41 = vld [vmem:[%s1311_s0 + $0x24] sm:$0xf0]  ;;  %v742_v42 = vld [vmem:[%s1311_s0 + $0xa0] sm:$0xf]  ;;  %v872_v44 = vld [vmem:[%s1311_s0 + $0x24] sm:$0xf] }
   0xd   :  { %v889_v43 = vld [vmem:[%s1311_s0 + $0xa4] sm:$0xf0]  ;;  %v680_v45 = vld [vmem:[%s1311_s0 + $0x28] sm:$0xf0]  ;;  %v888_v46 = vld [vmem:[%s1311_s0 + $0xa4] sm:$0xf]  ;;  %v679_v48 = vor.u32 %v873_v41, %v678_v40 }
   0xe   :  { %415 = vmatpush.bf16.msra.mxu0 %v856_v6  ;;  %903 = vmatpush.bf16.msra.mxu2 %v856_v6  ;;  %v744_v47 = vld [vmem:[%s1311_s0 + $0xa8] sm:$0xf0]  ;;  %v743_v49 = vor.u32 %v889_v43, %v742_v42  ;;  %v683_v50 = vor.u32 %v872_v44, %v680_v45  ;;  %v686_v52 = vld [vmem:[%s1311_s0 + $0x30] sm:$0xf]  ;;  %v875_v53 = vld [vmem:[%s1311_s0 + $0x34] sm:$0xf0] }
   0xf   :  { %504 = vmatpush.bf16.msra.mxu1 %v864_v7  ;;  %911 = vmatpush.bf16.msra.mxu3 %v864_v7  ;;  %v747_v51 = vor.u32 %v888_v46, %v744_v47  ;;  %v750_v54 = vld [vmem:[%s1311_s0 + $0xb0] sm:$0xf]  ;;  %v891_v55 = vld [vmem:[%s1311_s0 + $0xb4] sm:$0xf0]  ;;  %v874_v56 = vld [vmem:[%s1311_s0 + $0x34] sm:$0xf]  ;;  %v687_v60 = vor.u32 %v875_v53, %v686_v52 }
  0x10   :  { %v688_v57 = vld [vmem:[%s1311_s0 + $0x38] sm:$0xf0]  ;;  %v890_v58 = vld [vmem:[%s1311_s0 + $0xb4] sm:$0xf]  ;;  %v751_v61 = vor.u32 %v891_v55, %v750_v54  ;;  %v694_v0 = vld [vmem:[%s1311_s0 + $0x40] sm:$0xf] }
  0x11   :  { %v752_v59 = vld [vmem:[%s1311_s0 + $0xb8] sm:$0xf0]  ;;  %v691_v62 = vor.u32 %v874_v56, %v688_v57  ;;  %v877_v1 = vld [vmem:[%s1311_s0 + $0x44] sm:$0xf0]  ;;  %v758_v2 = vld [vmem:[%s1311_s0 + $0xc0] sm:$0xf] }
  0x12   :  { %416 = vmatpush.bf16.msra.mxu0 %v855_v8  ;;  %904 = vmatpush.bf16.msra.mxu2 %v855_v8  ;;  %v755_v63 = vor.u32 %v890_v58, %v752_v59  ;;  %v893_v3 = vld [vmem:[%s1311_s0 + $0xc4] sm:$0xf0]  ;;  %v876_v4 = vld [vmem:[%s1311_s0 + $0x44] sm:$0xf]  ;;  %v696_v5 = vld [vmem:[%s1311_s0 + $0x48] sm:$0xf0]  ;;  %v695_v8 = vor.u32 %v877_v1, %v694_v0 }
  0x13   :  { %505 = vmatpush.bf16.msra.mxu1 %v863_v9  ;;  %912 = vmatpush.bf16.msra.mxu3 %v863_v9  ;;  %v892_v6 = vld [vmem:[%s1311_s0 + $0xc4] sm:$0xf]  ;;  %v760_v7 = vld [vmem:[%s1311_s0 + $0xc8] sm:$0xf0]  ;;  %v759_v9 = vor.u32 %v893_v3, %v758_v2  ;;  %v878_v16 = vld [vmem:[%s1311_s0 + $0x54] sm:$0xf] }
  0x14   :  { %v704_v17 = vld [vmem:[%s1311_s0 + $0x58] sm:$0xf0]  ;;  %v894_v18 = vld [vmem:[%s1311_s0 + $0xd4] sm:$0xf]  ;;  %v880_v28 = vld [vmem:[%s1311_s0 + $0x64] sm:$0xf] }
  0x15   :  { %v768_v19 = vld [vmem:[%s1311_s0 + $0xd8] sm:$0xf0]  ;;  %v707_v22 = vor.u32 %v878_v16, %v704_v17  ;;  %v712_v29 = vld [vmem:[%s1311_s0 + $0x68] sm:$0xf0]  ;;  %v896_v30 = vld [vmem:[%s1311_s0 + $0xe4] sm:$0xf] }
  0x16   :  { %417 = vmatpush.bf16.msra.mxu0 %v854_v10  ;;  %905 = vmatpush.bf16.msra.mxu2 %v854_v10  ;;  %v699_v10 = vor.u32 %v876_v4, %v696_v5  ;;  %v771_v23 = vor.u32 %v894_v18, %v768_v19  ;;  %v776_v31 = vld [vmem:[%s1311_s0 + $0xe8] sm:$0xf0]  ;;  %v715_v34 = vor.u32 %v880_v28, %v712_v29  ;;  %v882_v40 = vld [vmem:[%s1311_s0 + $0x74] sm:$0xf]  ;;  %v720_v41 = vld [vmem:[%s1311_s0 + $0x78] sm:$0xf0] }
  0x17   :  { %506 = vmatpush.bf16.msra.mxu1 %v862_v11  ;;  %913 = vmatpush.bf16.msra.mxu3 %v862_v11  ;;  %v763_v11 = vor.u32 %v892_v6, %v760_v7  ;;  %v779_v35 = vor.u32 %v896_v30, %v776_v31  ;;  %v898_v42 = vld [vmem:[%s1311_s0 + $0xf4] sm:$0xf]  ;;  %v784_v43 = vld [vmem:[%s1311_s0 + $0xf8] sm:$0xf0]  ;;  %v723_v46 = vor.u32 %v882_v40, %v720_v41 }
  0x18   :  { %v787_v47 = vor.u32 %v898_v42, %v784_v43 }
  0x1a   :  { %418 = vmatpush.bf16.msra.mxu0 %v853_v12  ;;  %906 = vmatpush.bf16.msra.mxu2 %v853_v12  ;;  %v702_v12 = vld [vmem:[%s1311_s0 + $0x50] sm:$0xf] }
  0x1b   :  { %507 = vmatpush.bf16.msra.mxu1 %v861_v13  ;;  %914 = vmatpush.bf16.msra.mxu3 %v861_v13  ;;  %v879_v13 = vld [vmem:[%s1311_s0 + $0x54] sm:$0xf0] }
  0x1c   :  { %v703_v20 = vor.u32 %v879_v13, %v702_v12 }
  0x1e   :  { %419 = vmatpush.bf16.msra.mxu0 %v852_v14  ;;  %907 = vmatpush.bf16.msra.mxu2 %v852_v14  ;;  %v766_v14 = vld [vmem:[%s1311_s0 + $0xd0] sm:$0xf] }
  0x1f   :  { %508 = vmatpush.bf16.msra.mxu1 %v860_v15  ;;  %915 = vmatpush.bf16.msra.mxu3 %v860_v15  ;;  %v895_v15 = vld [vmem:[%s1311_s0 + $0xd4] sm:$0xf0] }
  0x20   :  { %v767_v21 = vor.u32 %v895_v15, %v766_v14 }
  0x21   :  { %420 = vmatmul.bf16.vlgmr.msra.gmra.mxu0 %v663_v24  ;;  %460 = vmatmul.bf16.vlgmr.msra.gmra.mxu2 %v727_v25  ;;  %v710_v24 = vld [vmem:[%s1311_s0 + $0x60] sm:$0xf]  ;;  %v881_v25 = vld [vmem:[%s1311_s0 + $0x64] sm:$0xf0] }
  0x22   :  { %509 = vmatmul.bf16.vlgmr.msra.gmra.mxu1 %v667_v26  ;;  %549 = vmatmul.bf16.vlgmr.msra.gmra.mxu3 %v731_v27  ;;  %v774_v26 = vld [vmem:[%s1311_s0 + $0xe0] sm:$0xf]  ;;  %v897_v27 = vld [vmem:[%s1311_s0 + $0xe4] sm:$0xf0]  ;;  %v711_v32 = vor.u32 %v881_v25, %v710_v24 }
  0x23   :  { %v775_v33 = vor.u32 %v897_v27, %v774_v26 }
  0x31   :  { %425 = vmatmul.bf16.gmra.mxu0 %v671_v36  ;;  %465 = vmatmul.bf16.gmra.mxu2 %v735_v37  ;;  %v718_v36 = vld [vmem:[%s1311_s0 + $0x70] sm:$0xf]  ;;  %v883_v37 = vld [vmem:[%s1311_s0 + $0x74] sm:$0xf0] }
  0x32   :  { %514 = vmatmul.bf16.gmra.mxu1 %v675_v38  ;;  %554 = vmatmul.bf16.gmra.mxu3 %v739_v39  ;;  %v782_v38 = vld [vmem:[%s1311_s0 + $0xf0] sm:$0xf]  ;;  %v899_v39 = vld [vmem:[%s1311_s0 + $0xf4] sm:$0xf0]  ;;  %v719_v44 = vor.u32 %v883_v37, %v718_v36 }
  0x33   :  { %v783_v45 = vor.u32 %v899_v39, %v782_v38 }
  0x41   :  { %430 = vmatmul.bf16.gmra.mxu0 %v679_v48  ;;  %470 = vmatmul.bf16.gmra.mxu2 %v743_v49  ;;  %v1180_v49 = vld [vmem:[%s1312_s2] ss:$0 sm:$0xff] }
  0x42   :  { %519 = vmatmul.bf16.gmra.mxu1 %v683_v50  ;;  %559 = vmatmul.bf16.gmra.mxu3 %v747_v51 }
  0x51   :  { %435 = vmatmul.bf16.gmra.mxu0 %v687_v60  ;;  %475 = vmatmul.bf16.gmra.mxu2 %v751_v61 }
  0x52   :  { %524 = vmatmul.bf16.gmra.mxu1 %v691_v62  ;;  %564 = vmatmul.bf16.gmra.mxu3 %v755_v63 }
  0x61   :  { %440 = vmatmul.bf16.gmra.mxu0 %v695_v8  ;;  %480 = vmatmul.bf16.gmra.mxu2 %v759_v9 }
  0x62   :  { %529 = vmatmul.bf16.gmra.mxu1 %v699_v10  ;;  %569 = vmatmul.bf16.gmra.mxu3 %v763_v11 }
  0x71   :  { %445 = vmatmul.bf16.gmra.mxu0 %v703_v20  ;;  %485 = vmatmul.bf16.gmra.mxu2 %v767_v21 }
  0x72   :  { %534 = vmatmul.bf16.gmra.mxu1 %v707_v22  ;;  %574 = vmatmul.bf16.gmra.mxu3 %v771_v23 }
  0x81   :  { %450 = vmatmul.bf16.gmra.mxu0 %v711_v32  ;;  %490 = vmatmul.bf16.gmra.mxu2 %v775_v33 }
  0x82   :  { %539 = vmatmul.bf16.gmra.mxu1 %v715_v34  ;;  %579 = vmatmul.bf16.gmra.mxu3 %v779_v35 }
  0x91   :  { %455 = vmatmul.bf16.gmra.mxu0 %v719_v44  ;;  %495 = vmatmul.bf16.gmra.mxu2 %v783_v45 }
  0x92   :  { %544 = vmatmul.bf16.gmra.mxu1 %v723_v46  ;;  %584 = vmatmul.bf16.gmra.mxu3 %v787_v47 }
  0x9e   :  { %v421_v48 = vpop.f32.mrf.mxu0 }
  0x9f   :  { %v510_v50 = vpop.f32.mrf.mxu1 }
  0xa0   :  { %v511_v51 = vadd.f32 %v510_v50, %v421_v48 }
  0xa2   :  { %v590_v52 = vadd.f32 %v1180_v49, %v511_v51 }
  0xa4   :  { %622 = vst [vmem:[%s1313_s3] sm:$0xff] %v590_v52  ;;  %v461_v53 = vpop.f32.mrf.mxu2 }
  0xa5   :  { %v550_v54 = vpop.f32.mrf.mxu3 }
  0xa6   :  { %v551_v55 = vadd.f32 %v550_v54, %v461_v53  ;;  %v423_v56 = vpop.f32.mrf.mxu0 }
  0xa7   :  { %v512_v57 = vpop.f32.mrf.mxu1 }
  0xa8   :  { %v606_v58 = vadd.f32 %v1180_v49, %v551_v55  ;;  %v513_v59 = vadd.f32 %v512_v57, %v423_v56 }
  0xaa   :  { %638 = vst [vmem:[%s1313_s3 + $0x80] sm:$0xff] %v606_v58  ;;  %v591_v60 = vadd.f32 %v1180_v49, %v513_v59 }
  0xac   :  { %623 = vst [vmem:[%s1313_s3 + $0x8] sm:$0xff] %v591_v60  ;;  %v463_v61 = vpop.f32.mrf.mxu2 }
  0xad   :  { %v552_v62 = vpop.f32.mrf.mxu3 }
  0xae   :  { %v553_v63 = vadd.f32 %v552_v62, %v463_v61  ;;  %v426_v0 = vpop.f32.mrf.mxu0 }
  0xaf   :  { %v515_v1 = vpop.f32.mrf.mxu1 }
  0xb0   :  { %v607_v2 = vadd.f32 %v1180_v49, %v553_v63  ;;  %v516_v3 = vadd.f32 %v515_v1, %v426_v0 }
  0xb2   :  { %639 = vst [vmem:[%s1313_s3 + $0x88] sm:$0xff] %v607_v2  ;;  %v592_v4 = vadd.f32 %v1180_v49, %v516_v3 }
  0xb4   :  { %624 = vst [vmem:[%s1313_s3 + $0x10] sm:$0xff] %v592_v4  ;;  %v466_v5 = vpop.f32.mrf.mxu2 }
  0xb5   :  { %v555_v6 = vpop.f32.mrf.mxu3 }
  0xb6   :  { %v556_v7 = vadd.f32 %v555_v6, %v466_v5  ;;  %v428_v8 = vpop.f32.mrf.mxu0 }
  0xb7   :  { %v517_v9 = vpop.f32.mrf.mxu1 }
  0xb8   :  { %v608_v10 = vadd.f32 %v1180_v49, %v556_v7  ;;  %v518_v11 = vadd.f32 %v517_v9, %v428_v8 }
  0xba   :  { %640 = vst [vmem:[%s1313_s3 + $0x90] sm:$0xff] %v608_v10  ;;  %v593_v12 = vadd.f32 %v1180_v49, %v518_v11 }
  0xbc   :  { %625 = vst [vmem:[%s1313_s3 + $0x18] sm:$0xff] %v593_v12  ;;  %v468_v13 = vpop.f32.mrf.mxu2 }
  0xbd   :  { %v557_v14 = vpop.f32.mrf.mxu3 }
  0xbe   :  { %v558_v15 = vadd.f32 %v557_v14, %v468_v13  ;;  %v431_v16 = vpop.f32.mrf.mxu0 }
  0xbf   :  { %v520_v17 = vpop.f32.mrf.mxu1 }
  0xc0   :  { %v609_v18 = vadd.f32 %v1180_v49, %v558_v15  ;;  %v521_v19 = vadd.f32 %v520_v17, %v431_v16 }
  0xc2   :  { %641 = vst [vmem:[%s1313_s3 + $0x98] sm:$0xff] %v609_v18  ;;  %v594_v20 = vadd.f32 %v1180_v49, %v521_v19 }
  0xc4   :  { %626 = vst [vmem:[%s1313_s3 + $0x20] sm:$0xff] %v594_v20  ;;  %v471_v21 = vpop.f32.mrf.mxu2 }
  0xc5   :  { %v560_v22 = vpop.f32.mrf.mxu3 }
  0xc6   :  { %v561_v23 = vadd.f32 %v560_v22, %v471_v21  ;;  %v433_v24 = vpop.f32.mrf.mxu0 }
  0xc7   :  { %v522_v25 = vpop.f32.mrf.mxu1 }
  0xc8   :  { %v610_v26 = vadd.f32 %v1180_v49, %v561_v23  ;;  %v523_v27 = vadd.f32 %v522_v25, %v433_v24 }
  0xca   :  { %642 = vst [vmem:[%s1313_s3 + $0xa0] sm:$0xff] %v610_v26  ;;  %v595_v28 = vadd.f32 %v1180_v49, %v523_v27 }
  0xcc   :  { %627 = vst [vmem:[%s1313_s3 + $0x28] sm:$0xff] %v595_v28  ;;  %v473_v29 = vpop.f32.mrf.mxu2 }
  0xcd   :  { %v562_v30 = vpop.f32.mrf.mxu3 }
  0xce   :  { %v563_v31 = vadd.f32 %v562_v30, %v473_v29  ;;  %v436_v32 = vpop.f32.mrf.mxu0 }
  0xcf   :  { %v525_v33 = vpop.f32.mrf.mxu1 }
  0xd0   :  { %v611_v34 = vadd.f32 %v1180_v49, %v563_v31  ;;  %v526_v35 = vadd.f32 %v525_v33, %v436_v32 }
  0xd2   :  { %643 = vst [vmem:[%s1313_s3 + $0xa8] sm:$0xff] %v611_v34  ;;  %v596_v36 = vadd.f32 %v1180_v49, %v526_v35 }
  0xd4   :  { %628 = vst [vmem:[%s1313_s3 + $0x30] sm:$0xff] %v596_v36  ;;  %v476_v37 = vpop.f32.mrf.mxu2 }
  0xd5   :  { %v565_v38 = vpop.f32.mrf.mxu3 }
  0xd6   :  { %v566_v39 = vadd.f32 %v565_v38, %v476_v37  ;;  %v438_v40 = vpop.f32.mrf.mxu0 }
  0xd7   :  { %v527_v41 = vpop.f32.mrf.mxu1 }
  0xd8   :  { %v612_v42 = vadd.f32 %v1180_v49, %v566_v39  ;;  %v528_v43 = vadd.f32 %v527_v41, %v438_v40 }
  0xda   :  { %644 = vst [vmem:[%s1313_s3 + $0xb0] sm:$0xff] %v612_v42  ;;  %v597_v44 = vadd.f32 %v1180_v49, %v528_v43 }
  0xdc   :  { %629 = vst [vmem:[%s1313_s3 + $0x38] sm:$0xff] %v597_v44  ;;  %v478_v45 = vpop.f32.mrf.mxu2 }
  0xdd   :  { %v567_v46 = vpop.f32.mrf.mxu3 }
  0xde   :  { %v568_v47 = vadd.f32 %v567_v46, %v478_v45  ;;  %v441_v48 = vpop.f32.mrf.mxu0 }
  0xdf   :  { %v530_v50 = vpop.f32.mrf.mxu1 }
  0xe0   :  { %v613_v51 = vadd.f32 %v1180_v49, %v568_v47  ;;  %v531_v52 = vadd.f32 %v530_v50, %v441_v48 }
  0xe2   :  { %645 = vst [vmem:[%s1313_s3 + $0xb8] sm:$0xff] %v613_v51  ;;  %v598_v53 = vadd.f32 %v1180_v49, %v531_v52 }
  0xe4   :  { %630 = vst [vmem:[%s1313_s3 + $0x40] sm:$0xff] %v598_v53  ;;  %v481_v54 = vpop.f32.mrf.mxu2 }
  0xe5   :  { %v570_v55 = vpop.f32.mrf.mxu3 }
  0xe6   :  { %v571_v56 = vadd.f32 %v570_v55, %v481_v54  ;;  %v443_v57 = vpop.f32.mrf.mxu0 }
  0xe7   :  { %v532_v58 = vpop.f32.mrf.mxu1 }
  0xe8   :  { %v614_v59 = vadd.f32 %v1180_v49, %v571_v56  ;;  %v533_v60 = vadd.f32 %v532_v58, %v443_v57 }
  0xea   :  { %646 = vst [vmem:[%s1313_s3 + $0xc0] sm:$0xff] %v614_v59  ;;  %v599_v61 = vadd.f32 %v1180_v49, %v533_v60 }
  0xec   :  { %631 = vst [vmem:[%s1313_s3 + $0x48] sm:$0xff] %v599_v61  ;;  %v483_v62 = vpop.f32.mrf.mxu2 }
  0xed   :  { %v572_v63 = vpop.f32.mrf.mxu3 }
  0xee   :  { %v573_v0 = vadd.f32 %v572_v63, %v483_v62  ;;  %v446_v1 = vpop.f32.mrf.mxu0 }
  0xef   :  { %v535_v2 = vpop.f32.mrf.mxu1 }
  0xf0   :  { %v615_v3 = vadd.f32 %v1180_v49, %v573_v0  ;;  %v536_v4 = vadd.f32 %v535_v2, %v446_v1 }
  0xf2   :  { %647 = vst [vmem:[%s1313_s3 + $0xc8] sm:$0xff] %v615_v3  ;;  %v600_v5 = vadd.f32 %v1180_v49, %v536_v4 }
  0xf4   :  { %632 = vst [vmem:[%s1313_s3 + $0x50] sm:$0xff] %v600_v5  ;;  %v486_v6 = vpop.f32.mrf.mxu2 }
  0xf5   :  { %v575_v7 = vpop.f32.mrf.mxu3 }
  0xf6   :  { %v576_v8 = vadd.f32 %v575_v7, %v486_v6  ;;  %v448_v9 = vpop.f32.mrf.mxu0 }
  0xf7   :  { %v537_v10 = vpop.f32.mrf.mxu1 }
  0xf8   :  { %v616_v11 = vadd.f32 %v1180_v49, %v576_v8  ;;  %v538_v12 = vadd.f32 %v537_v10, %v448_v9 }
  0xfa   :  { %648 = vst [vmem:[%s1313_s3 + $0xd0] sm:$0xff] %v616_v11  ;;  %v601_v13 = vadd.f32 %v1180_v49, %v538_v12 }
  0xfc   :  { %633 = vst [vmem:[%s1313_s3 + $0x58] sm:$0xff] %v601_v13  ;;  %v488_v14 = vpop.f32.mrf.mxu2 }
  0xfd   :  { %v577_v15 = vpop.f32.mrf.mxu3 }
  0xfe   :  { %v578_v16 = vadd.f32 %v577_v15, %v488_v14  ;;  %v451_v17 = vpop.f32.mrf.mxu0 }
  0xff   :  { %v540_v18 = vpop.f32.mrf.mxu1 }
 0x100   :  { %v617_v19 = vadd.f32 %v1180_v49, %v578_v16  ;;  %v541_v20 = vadd.f32 %v540_v18, %v451_v17 }
 0x102   :  { %649 = vst [vmem:[%s1313_s3 + $0xd8] sm:$0xff] %v617_v19  ;;  %v602_v21 = vadd.f32 %v1180_v49, %v541_v20 }
 0x104   :  { %634 = vst [vmem:[%s1313_s3 + $0x60] sm:$0xff] %v602_v21  ;;  %v491_v22 = vpop.f32.mrf.mxu2 }
 0x105   :  { %v580_v23 = vpop.f32.mrf.mxu3 }
 0x106   :  { %v581_v24 = vadd.f32 %v580_v23, %v491_v22  ;;  %v453_v25 = vpop.f32.mrf.mxu0 }
 0x107   :  { %v542_v26 = vpop.f32.mrf.mxu1 }
 0x108   :  { %v618_v27 = vadd.f32 %v1180_v49, %v581_v24  ;;  %v543_v28 = vadd.f32 %v542_v26, %v453_v25 }
 0x10a   :  { %650 = vst [vmem:[%s1313_s3 + $0xe0] sm:$0xff] %v618_v27  ;;  %v603_v29 = vadd.f32 %v1180_v49, %v543_v28 }
 0x10c   :  { %635 = vst [vmem:[%s1313_s3 + $0x68] sm:$0xff] %v603_v29  ;;  %v493_v30 = vpop.f32.mrf.mxu2 }
 0x10d   :  { %v582_v31 = vpop.f32.mrf.mxu3 }
 0x10e   :  { %v583_v32 = vadd.f32 %v582_v31, %v493_v30  ;;  %v456_v33 = vpop.f32.mrf.mxu0 }
 0x10f   :  { %v545_v34 = vpop.f32.mrf.mxu1 }
 0x110   :  { %v619_v35 = vadd.f32 %v1180_v49, %v583_v32  ;;  %v546_v36 = vadd.f32 %v545_v34, %v456_v33 }
 0x112   :  { %651 = vst [vmem:[%s1313_s3 + $0xe8] sm:$0xff] %v619_v35  ;;  %v604_v37 = vadd.f32 %v1180_v49, %v546_v36 }
 0x114   :  { %636 = vst [vmem:[%s1313_s3 + $0x70] sm:$0xff] %v604_v37  ;;  %v496_v38 = vpop.f32.mrf.mxu2 }
 0x115   :  { %v585_v39 = vpop.f32.mrf.mxu3 }
 0x116   :  { %v586_v40 = vadd.f32 %v585_v39, %v496_v38  ;;  %v458_v41 = vpop.f32.mrf.mxu0 }
 0x117   :  { %v547_v42 = vpop.f32.mrf.mxu1 }
 0x118   :  { %v620_v43 = vadd.f32 %v1180_v49, %v586_v40  ;;  %v548_v44 = vadd.f32 %v547_v42, %v458_v41 }
 0x11a   :  { %652 = vst [vmem:[%s1313_s3 + $0xf0] sm:$0xff] %v620_v43  ;;  %v605_v45 = vadd.f32 %v1180_v49, %v548_v44 }
 0x11c   :  { %637 = vst [vmem:[%s1313_s3 + $0x78] sm:$0xff] %v605_v45  ;;  %v498_v46 = vpop.f32.mrf.mxu2 }
 0x11d   :  { %v587_v47 = vpop.f32.mrf.mxu3 }
 0x11e   :  { %v588_v48 = vadd.f32 %v587_v47, %v498_v46 }
 0x120   :  { %v621_v50 = vadd.f32 %v1180_v49, %v588_v48 }
 0x122   :  { %653 = vst [vmem:[%s1313_s3 + $0xf8] sm:$0xff] %v621_v50 }

// kernel: gcn_forward.4
= control target key start
LH: loop header
LB: loop body
LE: loop exit
PB: predicated region body
PF: predicated region fallthrough
CT: control target
= control target key end

     0   :  { %s1792_s1 = inlined_call_operand.vmem [shape: bf16[256,128], index: 1, kind: input, shape index: {}]   ;;  %s1793_s0 = inlined_call_operand.vmem [shape: bf16[256,256], index: 0, kind: input, shape index: {}]   ;;  %s1794_s2 = inlined_call_operand.vmem [shape: f32[1,128], index: 2, kind: input, shape index: {}]   ;;  %s1795_s3 = inlined_call_operand.vmem [shape: bf16[128,128], index: 3, kind: input, shape index: {}]   ;;  %s1796_s4 = inlined_call_operand.vmem [shape: bf16[256,128], index: 4, kind: output, shape index: {}]  }
   0x1   :  { %v1225_v0 = vld [vmem:[%s1792_s1 + $0x38] sm:$0xff]  ;;  %v1224_v2 = vld [vmem:[%s1792_s1 + $0x30] sm:$0xff]  ;;  %v1223_v4 = vld [vmem:[%s1792_s1 + $0x28] sm:$0xff] }
   0x2   :  { %v1233_v1 = vld [vmem:[%s1792_s1 + $0x78] sm:$0xff]  ;;  %410 = vmatpush.bf16.msra.mxu0 %v1225_v0  ;;  %1369 = vmatpush.bf16.msra.mxu3 %v1225_v0  ;;  %v1232_v3 = vld [vmem:[%s1792_s1 + $0x70] sm:$0xff]  ;;  %v1231_v5 = vld [vmem:[%s1792_s1 + $0x68] sm:$0xff] }
   0x3   :  { %499 = vmatpush.bf16.msra.mxu1 %v1233_v1  ;;  %v1222_v6 = vld [vmem:[%s1792_s1 + $0x20] sm:$0xff]  ;;  %v1221_v8 = vld [vmem:[%s1792_s1 + $0x18] sm:$0xff]  ;;  %v1220_v10 = vld [vmem:[%s1792_s1 + $0x10] sm:$0xff] }
   0x4   :  { %v1230_v7 = vld [vmem:[%s1792_s1 + $0x60] sm:$0xff]  ;;  %v1229_v9 = vld [vmem:[%s1792_s1 + $0x58] sm:$0xff]  ;;  %v1228_v11 = vld [vmem:[%s1792_s1 + $0x50] sm:$0xff] }
   0x5   :  { %v1219_v12 = vld [vmem:[%s1792_s1 + $0x8] sm:$0xff]  ;;  %v1218_v14 = vld [vmem:[%s1792_s1] sm:$0xff]  ;;  %v1004_v25 = vld [vmem:[%s1793_s0 + $0x10] sm:$0xf] }
   0x6   :  { %411 = vmatpush.bf16.msra.mxu0 %v1224_v2  ;;  %1370 = vmatpush.bf16.msra.mxu3 %v1224_v2  ;;  %v1227_v13 = vld [vmem:[%s1792_s1 + $0x48] sm:$0xff]  ;;  %v996_v15 = vld [vmem:[%s1793_s0] sm:$0xf]  ;;  %v1234_v20 = vld [vmem:[%s1793_s0 + $0x4] sm:$0xf] }
   0x7   :  { %500 = vmatpush.bf16.msra.mxu1 %v1232_v3  ;;  %v1235_v16 = vld [vmem:[%s1793_s0 + $0x4] sm:$0xf0]  ;;  %v1092_v17 = vld [vmem:[%s1793_s0 + $0xc0] sm:$0xf]  ;;  %v998_v21 = vld [vmem:[%s1793_s0 + $0x8] sm:$0xf0] }
   0x8   :  { %v1259_v18 = vld [vmem:[%s1793_s0 + $0xc4] sm:$0xf0]  ;;  %v1226_v19 = vld [vmem:[%s1792_s1 + $0x40] sm:$0xff]  ;;  %v997_v22 = vor.u32 %v1235_v16, %v996_v15  ;;  %v1001_v24 = vor.u32 %v1234_v20, %v998_v21  ;;  %v1237_v26 = vld [vmem:[%s1793_s0 + $0x14] sm:$0xf0] }
   0x9   :  { %v1093_v23 = vor.u32 %v1259_v18, %v1092_v17  ;;  %v1100_v27 = vld [vmem:[%s1793_s0 + $0xd0] sm:$0xf]  ;;  %v1261_v28 = vld [vmem:[%s1793_s0 + $0xd4] sm:$0xf0]  ;;  %v1236_v29 = vld [vmem:[%s1793_s0 + $0x14] sm:$0xf]  ;;  %v1005_v31 = vor.u32 %v1237_v26, %v1004_v25 }
   0xa   :  { %412 = vmatpush.bf16.msra.mxu0 %v1223_v4  ;;  %1371 = vmatpush.bf16.msra.mxu3 %v1223_v4  ;;  %v1006_v30 = vld [vmem:[%s1793_s0 + $0x18] sm:$0xf0]  ;;  %v1101_v32 = vor.u32 %v1261_v28, %v1100_v27  ;;  %v1012_v34 = vld [vmem:[%s1793_s0 + $0x20] sm:$0xf]  ;;  %v1239_v35 = vld [vmem:[%s1793_s0 + $0x24] sm:$0xf0] }
   0xb   :  { %501 = vmatpush.bf16.msra.mxu1 %v1231_v5  ;;  %v1009_v33 = vor.u32 %v1236_v29, %v1006_v30  ;;  %v1108_v36 = vld [vmem:[%s1793_s0 + $0xe0] sm:$0xf]  ;;  %v1263_v37 = vld [vmem:[%s1793_s0 + $0xe4] sm:$0xf0]  ;;  %v1238_v38 = vld [vmem:[%s1793_s0 + $0x24] sm:$0xf]  ;;  %v1013_v40 = vor.u32 %v1239_v35, %v1012_v34 }
   0xc   :  { %v1014_v39 = vld [vmem:[%s1793_s0 + $0x28] sm:$0xf0]  ;;  %v1109_v41 = vor.u32 %v1263_v37, %v1108_v36  ;;  %v1020_v43 = vld [vmem:[%s1793_s0 + $0x30] sm:$0xf]  ;;  %v1241_v44 = vld [vmem:[%s1793_s0 + $0x34] sm:$0xf0] }
   0xd   :  { %v1017_v42 = vor.u32 %v1238_v38, %v1014_v39  ;;  %v1116_v45 = vld [vmem:[%s1793_s0 + $0xf0] sm:$0xf]  ;;  %v1265_v46 = vld [vmem:[%s1793_s0 + $0xf4] sm:$0xf0]  ;;  %v1240_v47 = vld [vmem:[%s1793_s0 + $0x34] sm:$0xf]  ;;  %v1021_v49 = vor.u32 %v1241_v44, %v1020_v43 }
   0xe   :  { %413 = vmatpush.bf16.msra.mxu0 %v1222_v6  ;;  %1372 = vmatpush.bf16.msra.mxu3 %v1222_v6  ;;  %v1022_v48 = vld [vmem:[%s1793_s0 + $0x38] sm:$0xf0]  ;;  %v1117_v50 = vor.u32 %v1265_v46, %v1116_v45  ;;  %v1028_v52 = vld [vmem:[%s1793_s0 + $0x40] sm:$0xf]  ;;  %v1243_v53 = vld [vmem:[%s1793_s0 + $0x44] sm:$0xf0] }
   0xf   :  { %502 = vmatpush.bf16.msra.mxu1 %v1230_v7  ;;  %v1025_v51 = vor.u32 %v1240_v47, %v1022_v48  ;;  %v1258_v54 = vld [vmem:[%s1793_s0 + $0xc4] sm:$0xf]  ;;  %v1094_v55 = vld [vmem:[%s1793_s0 + $0xc8] sm:$0xf0]  ;;  %v1029_v58 = vor.u32 %v1243_v53, %v1028_v52  ;;  %v1273_v61 = vld [vmem:[%s1795_s3 + $0x38] sm:$0xff] }
  0x10   :  { %v1242_v56 = vld [vmem:[%s1793_s0 + $0x44] sm:$0xf]  ;;  %v1030_v57 = vld [vmem:[%s1793_s0 + $0x48] sm:$0xf0]  ;;  %v1097_v59 = vor.u32 %v1258_v54, %v1094_v55  ;;  %835 = vmatpush.bf16.msra.mxu2 %v1273_v61  ;;  %v1036_v62 = vld [vmem:[%s1793_s0 + $0x50] sm:$0xf] }
  0x11   :  { %v1033_v60 = vor.u32 %v1242_v56, %v1030_v57  ;;  %v1245_v63 = vld [vmem:[%s1793_s0 + $0x54] sm:$0xf0]  ;;  %v1260_v0 = vld [vmem:[%s1793_s0 + $0xd4] sm:$0xf]  ;;  %v1046_v15 = vld [vmem:[%s1793_s0 + $0x68] sm:$0xf0] }
  0x12   :  { %414 = vmatpush.bf16.msra.mxu0 %v1221_v8  ;;  %1373 = vmatpush.bf16.msra.mxu3 %v1221_v8  ;;  %v1244_v2 = vld [vmem:[%s1793_s0 + $0x54] sm:$0xf]  ;;  %v1037_v4 = vor.u32 %v1245_v63, %v1036_v62  ;;  %v1271_v8 = vld [vmem:[%s1795_s3 + $0x28] sm:$0xff]  ;;  %v1118_v25 = vld [vmem:[%s1793_s0 + $0xf8] sm:$0xf0] }
  0x13   :  { %503 = vmatpush.bf16.msra.mxu1 %v1229_v9  ;;  %v1268_v20 = vld [vmem:[%s1795_s3 + $0x10] sm:$0xff]  ;;  %v1267_v21 = vld [vmem:[%s1795_s3 + $0x8] sm:$0xff]  ;;  %v1054_v27 = vld [vmem:[%s1793_s0 + $0x78] sm:$0xf0] }
  0x14   :  { %v1248_v26 = vld [vmem:[%s1793_s0 + $0x74] sm:$0xf]  ;;  %v1266_v28 = vld [vmem:[%s1795_s3] sm:$0xff]  ;;  %v1062_v35 = vld [vmem:[%s1793_s0 + $0x88] sm:$0xf0] }
  0x15   :  { %v1250_v34 = vld [vmem:[%s1793_s0 + $0x84] sm:$0xf]  ;;  %v1068_v48 = vld [vmem:[%s1793_s0 + $0x90] sm:$0xf] }
  0x16   :  { %415 = vmatpush.bf16.msra.mxu0 %v1220_v10  ;;  %1374 = vmatpush.bf16.msra.mxu3 %v1220_v10  ;;  %v1044_v10 = vld [vmem:[%s1793_s0 + $0x60] sm:$0xf]  ;;  %v1065_v38 = vor.u32 %v1250_v34, %v1062_v35 }
  0x17   :  { %504 = vmatpush.bf16.msra.mxu1 %v1228_v11 }
  0x1a   :  { %416 = vmatpush.bf16.msra.mxu0 %v1219_v12  ;;  %1375 = vmatpush.bf16.msra.mxu3 %v1219_v12  ;;  %v1262_v12 = vld [vmem:[%s1793_s0 + $0xe4] sm:$0xf] }
  0x1b   :  { %505 = vmatpush.bf16.msra.mxu1 %v1227_v13 }
  0x1e   :  { %417 = vmatpush.bf16.msra.mxu0 %v1218_v14  ;;  %1376 = vmatpush.bf16.msra.mxu3 %v1218_v14  ;;  %v1246_v14 = vld [vmem:[%s1793_s0 + $0x64] sm:$0xf] }
  0x1f   :  { %506 = vmatpush.bf16.msra.mxu1 %v1226_v19  ;;  %v1049_v18 = vor.u32 %v1246_v14, %v1046_v15 }
  0x21   :  { %418 = vmatmul.bf16.vlgmr.msra.gmra.mxu0 %v997_v22  ;;  %478 = vmatmul.bf16.vlgmr.msra.gmra.mxu3 %v1093_v23  ;;  %v1052_v22 = vld [vmem:[%s1793_s0 + $0x70] sm:$0xf]  ;;  %v1249_v23 = vld [vmem:[%s1793_s0 + $0x74] sm:$0xf0] }
  0x22   :  { %1377 = vmatpush.bf16.msrb.mxu3 %v1233_v1  ;;  %507 = vmatmul.bf16.vlgmr.msra.gmra.mxu1 %v1001_v24  ;;  %v1102_v1 = vld [vmem:[%s1793_s0 + $0xd8] sm:$0xf0]  ;;  %v1264_v24 = vld [vmem:[%s1793_s0 + $0xf4] sm:$0xf]  ;;  %v1053_v29 = vor.u32 %v1249_v23, %v1052_v22  ;;  %v1084_v22 = vld [vmem:[%s1793_s0 + $0xb0] sm:$0xf] }
  0x23   :  { %v1121_v30 = vor.u32 %v1264_v24, %v1118_v25  ;;  %v1257_v23 = vld [vmem:[%s1793_s0 + $0xb4] sm:$0xf0]  ;;  %v1256_v24 = vld [vmem:[%s1793_s0 + $0xb4] sm:$0xf]  ;;  %v1086_v25 = vld [vmem:[%s1793_s0 + $0xb8] sm:$0xf0] }
  0x26   :  { %1378 = vmatpush.bf16.msrb.mxu3 %v1232_v3  ;;  %v1038_v3 = vld [vmem:[%s1793_s0 + $0x58] sm:$0xf0] }
  0x27   :  { %v1041_v6 = vor.u32 %v1244_v2, %v1038_v3  ;;  %v1076_v3 = vld [vmem:[%s1793_s0 + $0xa0] sm:$0xf] }
  0x2a   :  { %1379 = vmatpush.bf16.msrb.mxu3 %v1231_v5  ;;  %v1105_v5 = vor.u32 %v1260_v0, %v1102_v1 }
  0x2e   :  { %1380 = vmatpush.bf16.msrb.mxu3 %v1230_v7  ;;  %v1272_v7 = vld [vmem:[%s1795_s3 + $0x30] sm:$0xff] }
  0x2f   :  { %836 = vmatpush.bf16.msra.mxu2 %v1272_v7 }
  0x31   :  { %423 = vmatmul.bf16.gmra.mxu0 %v1005_v31  ;;  %483 = vmatmul.bf16.gmra.mxu3 %v1101_v32  ;;  %v1057_v31 = vor.u32 %v1248_v26, %v1054_v27  ;;  %v1060_v32 = vld [vmem:[%s1793_s0 + $0x80] sm:$0xf] }
  0x32   :  { %1381 = vmatpush.bf16.msrb.mxu3 %v1229_v9  ;;  %512 = vmatmul.bf16.gmra.mxu1 %v1009_v33  ;;  %v1270_v9 = vld [vmem:[%s1795_s3 + $0x20] sm:$0xff]  ;;  %v1251_v33 = vld [vmem:[%s1793_s0 + $0x84] sm:$0xf0] }
  0x33   :  { %837 = vmatpush.bf16.msra.mxu2 %v1271_v8  ;;  %v1061_v36 = vor.u32 %v1251_v33, %v1060_v32  ;;  %v1089_v32 = vor.u32 %v1256_v24, %v1086_v25 }
  0x36   :  { %1382 = vmatpush.bf16.msrb.mxu3 %v1228_v11  ;;  %v1247_v11 = vld [vmem:[%s1793_s0 + $0x64] sm:$0xf0] }
  0x37   :  { %838 = vmatpush.bf16.msra.mxu2 %v1270_v9  ;;  %v1045_v16 = vor.u32 %v1247_v11, %v1044_v10 }
  0x3a   :  { %1383 = vmatpush.bf16.msrb.mxu3 %v1227_v13  ;;  %v1110_v13 = vld [vmem:[%s1793_s0 + $0xe8] sm:$0xf0] }
  0x3b   :  { %v1113_v17 = vor.u32 %v1262_v12, %v1110_v13 }
  0x3e   :  { %1384 = vmatpush.bf16.msrb.mxu3 %v1226_v19  ;;  %v1269_v19 = vld [vmem:[%s1795_s3 + $0x18] sm:$0xff] }
  0x3f   :  { %839 = vmatpush.bf16.msra.mxu2 %v1269_v19 }
  0x41   :  { %428 = vmatmul.bf16.gmra.mxu0 %v1013_v40  ;;  %488 = vmatmul.bf16.gmra.mxu3 %v1109_v41  ;;  %v1650_v41 = vld [vmem:[%s1794_s2] ss:$0 sm:$0xff] }
  0x42   :  { %517 = vmatmul.bf16.gmra.mxu1 %v1017_v42  ;;  %1385 = vmatpush.bf16.msra.mxu3 %v1273_v61 }
  0x43   :  { %840 = vmatpush.bf16.msra.mxu2 %v1268_v20 }
  0x46   :  { %1386 = vmatpush.bf16.msra.mxu3 %v1272_v7 }
  0x47   :  { %841 = vmatpush.bf16.msra.mxu2 %v1267_v21 }
  0x4a   :  { %1387 = vmatpush.bf16.msra.mxu3 %v1271_v8 }
  0x4b   :  { %842 = vmatpush.bf16.msra.mxu2 %v1266_v28 }
  0x4e   :  { %1388 = vmatpush.bf16.msra.mxu3 %v1270_v9 }
  0x51   :  { %433 = vmatmul.bf16.gmra.mxu0 %v1021_v49  ;;  %493 = vmatmul.bf16.gmra.mxu3 %v1117_v50  ;;  %v1253_v49 = vld [vmem:[%s1793_s0 + $0x94] sm:$0xf0]  ;;  %v1252_v50 = vld [vmem:[%s1793_s0 + $0x94] sm:$0xf] }
  0x52   :  { %522 = vmatmul.bf16.gmra.mxu1 %v1025_v51  ;;  %1389 = vmatpush.bf16.msra.mxu3 %v1269_v19  ;;  %v1070_v51 = vld [vmem:[%s1793_s0 + $0x98] sm:$0xf0]  ;;  %v1069_v55 = vor.u32 %v1253_v49, %v1068_v48 }
  0x56   :  { %1390 = vmatpush.bf16.msra.mxu3 %v1268_v20 }
  0x5a   :  { %1391 = vmatpush.bf16.msra.mxu3 %v1267_v21 }
  0x5e   :  { %1392 = vmatpush.bf16.msra.mxu3 %v1266_v28 }
  0x61   :  { %438 = vmatmul.bf16.gmra.mxu0 %v1029_v58  ;;  %567 = vmatmul.bf16.vlgmr.msrb.gmra.mxu3 %v1097_v59  ;;  %v1073_v58 = vor.u32 %v1252_v50, %v1070_v51 }
  0x62   :  { %527 = vmatmul.bf16.gmra.mxu1 %v1033_v60 }
  0x71   :  { %443 = vmatmul.bf16.gmra.mxu0 %v1037_v4  ;;  %572 = vmatmul.bf16.gmra.mxu3 %v1105_v5  ;;  %v1255_v4 = vld [vmem:[%s1793_s0 + $0xa4] sm:$0xf0]  ;;  %v1254_v5 = vld [vmem:[%s1793_s0 + $0xa4] sm:$0xf] }
  0x72   :  { %532 = vmatmul.bf16.gmra.mxu1 %v1041_v6  ;;  %v1078_v6 = vld [vmem:[%s1793_s0 + $0xa8] sm:$0xf0]  ;;  %v1077_v10 = vor.u32 %v1255_v4, %v1076_v3 }
  0x73   :  { %v1081_v13 = vor.u32 %v1254_v5, %v1078_v6 }
  0x81   :  { %448 = vmatmul.bf16.gmra.mxu0 %v1045_v16  ;;  %577 = vmatmul.bf16.gmra.mxu3 %v1113_v17 }
  0x82   :  { %537 = vmatmul.bf16.gmra.mxu1 %v1049_v18 }
  0x91   :  { %453 = vmatmul.bf16.gmra.mxu0 %v1053_v29  ;;  %582 = vmatmul.bf16.gmra.mxu3 %v1121_v30  ;;  %v1085_v29 = vor.u32 %v1257_v23, %v1084_v22 }
  0x92   :  { %542 = vmatmul.bf16.gmra.mxu1 %v1057_v31 }
  0x9e   :  { %v419_v37 = vpop.f32.mrf.mxu0 }
  0x9f   :  { %v508_v39 = vpop.f32.mrf.mxu1 }
  0xa0   :  { %v509_v40 = vadd.f32 %v508_v39, %v419_v37 }
  0xa1   :  { %458 = vmatmul.bf16.gmra.mxu0 %v1061_v36 }
  0xa2   :  { %547 = vmatmul.bf16.gmra.mxu1 %v1065_v38  ;;  %v691_v45 = vadd.f32 %v1650_v41, %v509_v40 }
  0xa4   :  { %v1652_v42 = vpop.f32.mrf.mxu3  ;;  %v723_v52 = vmax.f32 %v691_v45, 0.0 }
  0xa6   :  { %v421_v43 = vpop.f32.mrf.mxu0 }
  0xa7   :  { %v510_v44 = vpop.f32.mrf.mxu1 }
  0xa8   :  { %v511_v46 = vadd.f32 %v510_v44, %v421_v43 }
  0xaa   :  { %v692_v47 = vadd.f32 %v1650_v41, %v511_v46 }
  0xac   :  { %v724_v53 = vmax.f32 %v692_v47, 0.0  ;;  %v1668_v54 = vpop.f32.mrf.mxu3 }
  0xae   :  { %v424_v56 = vpop.f32.mrf.mxu0  ;;  %v755_v57 = vpack.c.bf16 %v724_v53, %v723_v52 }
  0xaf   :  { %v513_v59 = vpop.f32.mrf.mxu1 }
  0xb0   :  { %843 = vmatmul.bf16.vlgmr.msra.gmra.mxu2 %v755_v57  ;;  %v514_v60 = vadd.f32 %v513_v59, %v424_v56 }
  0xb1   :  { %463 = vmatmul.bf16.gmra.mxu0 %v1069_v55 }
  0xb2   :  { %552 = vmatmul.bf16.gmra.mxu1 %v1073_v58  ;;  %v693_v0 = vadd.f32 %v1650_v41, %v514_v60 }
  0xb4   :  { %v1670_v61 = vpop.f32.mrf.mxu3  ;;  %v725_v7 = vmax.f32 %v693_v0, 0.0 }
  0xb6   :  { %v426_v62 = vpop.f32.mrf.mxu0 }
  0xb7   :  { %v515_v63 = vpop.f32.mrf.mxu1 }
  0xb8   :  { %v516_v1 = vadd.f32 %v515_v63, %v426_v62 }
  0xba   :  { %v694_v2 = vadd.f32 %v1650_v41, %v516_v1 }
  0xbc   :  { %v726_v8 = vmax.f32 %v694_v2, 0.0  ;;  %v1686_v9 = vpop.f32.mrf.mxu3 }
  0xbe   :  { %v429_v11 = vpop.f32.mrf.mxu0  ;;  %v756_v12 = vpack.c.bf16 %v726_v8, %v725_v7 }
  0xbf   :  { %v518_v14 = vpop.f32.mrf.mxu1 }
  0xc0   :  { %848 = vmatmul.bf16.gmra.mxu2 %v756_v12  ;;  %v519_v15 = vadd.f32 %v518_v14, %v429_v11 }
  0xc1   :  { %468 = vmatmul.bf16.gmra.mxu0 %v1077_v10 }
  0xc2   :  { %557 = vmatmul.bf16.gmra.mxu1 %v1081_v13  ;;  %v695_v19 = vadd.f32 %v1650_v41, %v519_v15 }
  0xc4   :  { %v1688_v16 = vpop.f32.mrf.mxu3  ;;  %v727_v26 = vmax.f32 %v695_v19, 0.0 }
  0xc6   :  { %v431_v17 = vpop.f32.mrf.mxu0 }
  0xc7   :  { %v520_v18 = vpop.f32.mrf.mxu1 }
  0xc8   :  { %v521_v20 = vadd.f32 %v520_v18, %v431_v17 }
  0xca   :  { %v696_v21 = vadd.f32 %v1650_v41, %v521_v20 }
  0xcc   :  { %v728_v27 = vmax.f32 %v696_v21, 0.0  ;;  %v1704_v28 = vpop.f32.mrf.mxu3 }
  0xce   :  { %v434_v30 = vpop.f32.mrf.mxu0  ;;  %v757_v31 = vpack.c.bf16 %v728_v27, %v727_v26 }
  0xcf   :  { %v523_v33 = vpop.f32.mrf.mxu1 }
  0xd0   :  { %853 = vmatmul.bf16.gmra.mxu2 %v757_v31  ;;  %v524_v34 = vadd.f32 %v523_v33, %v434_v30 }
  0xd1   :  { %473 = vmatmul.bf16.gmra.mxu0 %v1085_v29 }
  0xd2   :  { %562 = vmatmul.bf16.gmra.mxu1 %v1089_v32  ;;  %v697_v38 = vadd.f32 %v1650_v41, %v524_v34 }
  0xd4   :  { %v1706_v35 = vpop.f32.mrf.mxu3  ;;  %v729_v43 = vmax.f32 %v697_v38, 0.0 }
  0xd6   :  { %v436_v36 = vpop.f32.mrf.mxu0 }
  0xd7   :  { %v525_v37 = vpop.f32.mrf.mxu1 }
  0xd8   :  { %v526_v39 = vadd.f32 %v525_v37, %v436_v36 }
  0xda   :  { %v698_v40 = vadd.f32 %v1650_v41, %v526_v39 }
  0xdc   :  { %v730_v44 = vmax.f32 %v698_v40, 0.0  ;;  %v1710_v45 = vpop.f32.mrf.mxu3 }
  0xde   :  { %v439_v46 = vpop.f32.mrf.mxu0  ;;  %v758_v47 = vpack.c.bf16 %v730_v44, %v729_v43 }
  0xdf   :  { %v528_v48 = vpop.f32.mrf.mxu1 }
  0xe0   :  { %858 = vmatmul.bf16.gmra.mxu2 %v758_v47  ;;  %v529_v49 = vadd.f32 %v528_v48, %v439_v46 }
  0xe2   :  { %v699_v53 = vadd.f32 %v1650_v41, %v529_v49 }
  0xe4   :  { %v568_v50 = vpop.f32.mrf.mxu3  ;;  %v731_v58 = vmax.f32 %v699_v53, 0.0 }
  0xe5   :  { %v569_v56 = vadd.f32 %v568_v50, %v1652_v42 }
  0xe6   :  { %v441_v51 = vpop.f32.mrf.mxu0 }
  0xe7   :  { %v530_v52 = vpop.f32.mrf.mxu1  ;;  %v715_v62 = vadd.f32 %v1650_v41, %v569_v56 }
  0xe8   :  { %v531_v55 = vadd.f32 %v530_v52, %v441_v51 }
  0xe9   :  { %v747_v4 = vmax.f32 %v715_v62, 0.0 }
  0xea   :  { %v700_v57 = vadd.f32 %v1650_v41, %v531_v55 }
  0xec   :  { %v732_v59 = vmax.f32 %v700_v57, 0.0  ;;  %v570_v60 = vpop.f32.mrf.mxu3 }
  0xed   :  { %v571_v63 = vadd.f32 %v570_v60, %v1668_v54 }
  0xee   :  { %v444_v0 = vpop.f32.mrf.mxu0  ;;  %v759_v1 = vpack.c.bf16 %v732_v59, %v731_v58 }
  0xef   :  { %v716_v2 = vadd.f32 %v1650_v41, %v571_v63  ;;  %v533_v3 = vpop.f32.mrf.mxu1 }
  0xf0   :  { %863 = vmatmul.bf16.gmra.mxu2 %v759_v1  ;;  %v534_v7 = vadd.f32 %v533_v3, %v444_v0 }
  0xf1   :  { %v748_v5 = vmax.f32 %v716_v2, 0.0 }
  0xf2   :  { %v701_v11 = vadd.f32 %v1650_v41, %v534_v7 }
  0xf3   :  { %v767_v6 = vpack.c.bf16 %v748_v5, %v747_v4 }
  0xf4   :  { %v573_v42 = vpop.f32.mrf.mxu3  ;;  %v733_v14 = vmax.f32 %v701_v11, 0.0 }
  0xf5   :  { %903 = vmatmul.bf16.vlgmr.msra.gmra.mxu3 %v767_v6  ;;  %v574_v13 = vadd.f32 %v573_v42, %v1670_v61 }
  0xf6   :  { %v446_v8 = vpop.f32.mrf.mxu0 }
  0xf7   :  { %v535_v10 = vpop.f32.mrf.mxu1  ;;  %v717_v18 = vadd.f32 %v1650_v41, %v574_v13 }
  0xf8   :  { %v536_v12 = vadd.f32 %v535_v10, %v446_v8 }
  0xf9   :  { %v749_v24 = vmax.f32 %v717_v18, 0.0 }
  0xfa   :  { %v702_v54 = vadd.f32 %v1650_v41, %v536_v12 }
  0xfc   :  { %v734_v15 = vmax.f32 %v702_v54, 0.0  ;;  %v575_v17 = vpop.f32.mrf.mxu3 }
  0xfd   :  { %v576_v19 = vadd.f32 %v575_v17, %v1686_v9 }
  0xfe   :  { %v449_v20 = vpop.f32.mrf.mxu0  ;;  %v760_v21 = vpack.c.bf16 %v734_v15, %v733_v14 }
  0xff   :  { %v718_v22 = vadd.f32 %v1650_v41, %v576_v19  ;;  %v538_v23 = vpop.f32.mrf.mxu1 }
 0x100   :  { %868 = vmatmul.bf16.gmra.mxu2 %v760_v21  ;;  %v539_v27 = vadd.f32 %v538_v23, %v449_v20 }
 0x101   :  { %v750_v25 = vmax.f32 %v718_v22, 0.0 }
 0x102   :  { %v703_v31 = vadd.f32 %v1650_v41, %v539_v27 }
 0x103   :  { %v768_v26 = vpack.c.bf16 %v750_v25, %v749_v24 }
 0x104   :  { %v578_v61 = vpop.f32.mrf.mxu3  ;;  %v735_v34 = vmax.f32 %v703_v31, 0.0 }
 0x105   :  { %908 = vmatmul.bf16.gmra.mxu3 %v768_v26  ;;  %v579_v33 = vadd.f32 %v578_v61, %v1688_v16 }
 0x106   :  { %v451_v29 = vpop.f32.mrf.mxu0 }
 0x107   :  { %v540_v30 = vpop.f32.mrf.mxu1  ;;  %v719_v38 = vadd.f32 %v1650_v41, %v579_v33 }
 0x108   :  { %v541_v32 = vadd.f32 %v540_v30, %v451_v29 }
 0x109   :  { %v751_v47 = vmax.f32 %v719_v38, 0.0 }
 0x10a   :  { %v704_v9 = vadd.f32 %v1650_v41, %v541_v32 }
 0x10c   :  { %v736_v36 = vmax.f32 %v704_v9, 0.0  ;;  %v580_v37 = vpop.f32.mrf.mxu3 }
 0x10d   :  { %v581_v39 = vadd.f32 %v580_v37, %v1704_v28 }
 0x10e   :  { %v454_v40 = vpop.f32.mrf.mxu0  ;;  %v761_v43 = vpack.c.bf16 %v736_v36, %v735_v34 }
 0x10f   :  { %v720_v44 = vadd.f32 %v1650_v41, %v581_v39  ;;  %v543_v46 = vpop.f32.mrf.mxu1 }
 0x110   :  { %873 = vmatmul.bf16.gmra.mxu2 %v761_v43  ;;  %v544_v50 = vadd.f32 %v543_v46, %v454_v40 }
 0x111   :  { %v752_v48 = vmax.f32 %v720_v44, 0.0 }
 0x112   :  { %v705_v53 = vadd.f32 %v1650_v41, %v544_v50 }
 0x113   :  { %v769_v49 = vpack.c.bf16 %v752_v48, %v751_v47 }
 0x114   :  { %v583_v16 = vpop.f32.mrf.mxu3  ;;  %v737_v57 = vmax.f32 %v705_v53, 0.0 }
 0x115   :  { %913 = vmatmul.bf16.gmra.mxu3 %v769_v49  ;;  %v584_v56 = vadd.f32 %v583_v16, %v1706_v35 }
 0x116   :  { %v456_v51 = vpop.f32.mrf.mxu0 }
 0x117   :  { %v545_v52 = vpop.f32.mrf.mxu1  ;;  %v721_v60 = vadd.f32 %v1650_v41, %v584_v56 }
 0x118   :  { %v546_v55 = vadd.f32 %v545_v52, %v456_v51 }
 0x119   :  { %v753_v3 = vmax.f32 %v721_v60, 0.0 }
 0x11a   :  { %v706_v28 = vadd.f32 %v1650_v41, %v546_v55 }
 0x11c   :  { %v738_v58 = vmax.f32 %v706_v28, 0.0  ;;  %v585_v59 = vpop.f32.mrf.mxu3 }
 0x11d   :  { %v586_v62 = vadd.f32 %v585_v59, %v1710_v45 }
 0x11e   :  { %v459_v63 = vpop.f32.mrf.mxu0  ;;  %v762_v0 = vpack.c.bf16 %v738_v58, %v737_v57 }
 0x11f   :  { %v722_v1 = vadd.f32 %v1650_v41, %v586_v62  ;;  %v548_v2 = vpop.f32.mrf.mxu1 }
 0x120   :  { %878 = vmatmul.bf16.gmra.mxu2 %v762_v0  ;;  %v549_v6 = vadd.f32 %v548_v2, %v459_v63 }
 0x121   :  { %v754_v4 = vmax.f32 %v722_v1, 0.0 }
 0x122   :  { %v707_v42 = vadd.f32 %v1650_v41, %v549_v6 }
 0x123   :  { %v770_v5 = vpack.c.bf16 %v754_v4, %v753_v3 }
 0x124   :  { %v739_v11 = vmax.f32 %v707_v42, 0.0 }
 0x125   :  { %918 = vmatmul.bf16.gmra.mxu3 %v770_v5 }
 0x126   :  { %v461_v35 = vpop.f32.mrf.mxu0 }
 0x127   :  { %v550_v7 = vpop.f32.mrf.mxu1 }
 0x128   :  { %v551_v8 = vadd.f32 %v550_v7, %v461_v35 }
 0x12a   :  { %v708_v10 = vadd.f32 %v1650_v41, %v551_v8 }
 0x12c   :  { %v740_v45 = vmax.f32 %v708_v10, 0.0 }
 0x12e   :  { %v464_v12 = vpop.f32.mrf.mxu0  ;;  %v763_v13 = vpack.c.bf16 %v740_v45, %v739_v11 }
 0x12f   :  { %v553_v54 = vpop.f32.mrf.mxu1 }
 0x130   :  { %883 = vmatmul.bf16.gmra.mxu2 %v763_v13  ;;  %v554_v15 = vadd.f32 %v553_v54, %v464_v12 }
 0x132   :  { %v709_v19 = vadd.f32 %v1650_v41, %v554_v15 }
 0x133   :  { %v844_v14 = vpop.f32.mrf.mxu2 }
 0x134   :  { %v741_v23 = vmax.f32 %v709_v19, 0.0 }
 0x136   :  { %v466_v17 = vpop.f32.mrf.mxu0 }
 0x137   :  { %v555_v18 = vpop.f32.mrf.mxu1 }
 0x138   :  { %v556_v20 = vadd.f32 %v555_v18, %v466_v17 }
 0x13a   :  { %v710_v21 = vadd.f32 %v1650_v41, %v556_v20 }
 0x13b   :  { %v846_v22 = vpop.f32.mrf.mxu2 }
 0x13c   :  { %v742_v24 = vmax.f32 %v710_v21, 0.0  ;;  %v1277_v25 = vpack.c.bf16 %v846_v22, %v844_v14 }
 0x13e   :  { %1278 = vst [vmem:[%s1796_s4] sm:$0xff] %v1277_v25   ;;  %v469_v26 = vpop.f32.mrf.mxu0  ;;  %v764_v27 = vpack.c.bf16 %v742_v24, %v741_v23 }
 0x13f   :  { %v558_v61 = vpop.f32.mrf.mxu1 }
 0x140   :  { %888 = vmatmul.bf16.gmra.mxu2 %v764_v27  ;;  %v559_v30 = vadd.f32 %v558_v61, %v469_v26 }
 0x142   :  { %v711_v33 = vadd.f32 %v1650_v41, %v559_v30 }
 0x143   :  { %v849_v29 = vpop.f32.mrf.mxu2 }
 0x144   :  { %v743_v37 = vmax.f32 %v711_v33, 0.0 }
 0x146   :  { %v471_v31 = vpop.f32.mrf.mxu0 }
 0x147   :  { %v560_v32 = vpop.f32.mrf.mxu1 }
 0x148   :  { %v561_v9 = vadd.f32 %v560_v32, %v471_v31 }
 0x14a   :  { %v712_v34 = vadd.f32 %v1650_v41, %v561_v9 }
 0x14b   :  { %v851_v36 = vpop.f32.mrf.mxu2 }
 0x14c   :  { %v744_v38 = vmax.f32 %v712_v34, 0.0  ;;  %v1282_v39 = vpack.c.bf16 %v851_v36, %v849_v29 }
 0x14e   :  { %1354 = vst [vmem:[%s1796_s4 + $0x8] sm:$0xff] %v1282_v39   ;;  %v474_v40 = vpop.f32.mrf.mxu0  ;;  %v765_v43 = vpack.c.bf16 %v744_v38, %v743_v37 }
 0x14f   :  { %v563_v44 = vpop.f32.mrf.mxu1 }
 0x150   :  { %893 = vmatmul.bf16.gmra.mxu2 %v765_v43  ;;  %v564_v47 = vadd.f32 %v563_v44, %v474_v40 }
 0x152   :  { %v713_v50 = vadd.f32 %v1650_v41, %v564_v47 }
 0x153   :  { %v854_v46 = vpop.f32.mrf.mxu2 }
 0x154   :  { %v745_v53 = vmax.f32 %v713_v50, 0.0 }
 0x156   :  { %v476_v48 = vpop.f32.mrf.mxu0 }
 0x157   :  { %v565_v49 = vpop.f32.mrf.mxu1 }
 0x158   :  { %v566_v16 = vadd.f32 %v565_v49, %v476_v48 }
 0x15a   :  { %v714_v51 = vadd.f32 %v1650_v41, %v566_v16 }
 0x15b   :  { %v856_v52 = vpop.f32.mrf.mxu2 }
 0x15c   :  { %v746_v55 = vmax.f32 %v714_v51, 0.0  ;;  %v1287_v56 = vpack.c.bf16 %v856_v52, %v854_v46 }
 0x15e   :  { %1355 = vst [vmem:[%s1796_s4 + $0x10] sm:$0xff] %v1287_v56   ;;  %v766_v28 = vpack.c.bf16 %v746_v55, %v745_v53 }
 0x160   :  { %898 = vmatmul.bf16.gmra.mxu2 %v766_v28 }
 0x163   :  { %v859_v57 = vpop.f32.mrf.mxu2 }
 0x16b   :  { %v861_v58 = vpop.f32.mrf.mxu2 }
 0x16c   :  { %v1292_v59 = vpack.c.bf16 %v861_v58, %v859_v57 }
 0x16e   :  { %1356 = vst [vmem:[%s1796_s4 + $0x18] sm:$0xff] %v1292_v59  }
 0x173   :  { %v864_v60 = vpop.f32.mrf.mxu2 }
 0x178   :  { %v904_v62 = vpop.f32.mrf.mxu3 }
 0x17b   :  { %v866_v41 = vpop.f32.mrf.mxu2 }
 0x17c   :  { %v1297_v63 = vpack.c.bf16 %v866_v41, %v864_v60 }
 0x17e   :  { %1357 = vst [vmem:[%s1796_s4 + $0x20] sm:$0xff] %v1297_v63  }
 0x180   :  { %v906_v0 = vpop.f32.mrf.mxu3 }
 0x181   :  { %v1337_v1 = vpack.c.bf16 %v906_v0, %v904_v62 }
 0x183   :  { %1365 = vst [vmem:[%s1796_s4 + $0x60] sm:$0xff] %v1337_v1   ;;  %v869_v2 = vpop.f32.mrf.mxu2 }
 0x188   :  { %v909_v3 = vpop.f32.mrf.mxu3 }
 0x18b   :  { %v871_v4 = vpop.f32.mrf.mxu2 }
 0x18c   :  { %v1302_v5 = vpack.c.bf16 %v871_v4, %v869_v2 }
 0x18e   :  { %1358 = vst [vmem:[%s1796_s4 + $0x28] sm:$0xff] %v1302_v5  }
 0x190   :  { %v911_v6 = vpop.f32.mrf.mxu3 }
 0x191   :  { %v1342_v35 = vpack.c.bf16 %v911_v6, %v909_v3 }
 0x193   :  { %1366 = vst [vmem:[%s1796_s4 + $0x68] sm:$0xff] %v1342_v35   ;;  %v874_v7 = vpop.f32.mrf.mxu2 }
 0x198   :  { %v914_v42 = vpop.f32.mrf.mxu3 }
 0x19b   :  { %v876_v8 = vpop.f32.mrf.mxu2 }
 0x19c   :  { %v1307_v10 = vpack.c.bf16 %v876_v8, %v874_v7 }
 0x19e   :  { %1359 = vst [vmem:[%s1796_s4 + $0x30] sm:$0xff] %v1307_v10  }
 0x1a0   :  { %v916_v11 = vpop.f32.mrf.mxu3 }
 0x1a1   :  { %v1347_v45 = vpack.c.bf16 %v916_v11, %v914_v42 }
 0x1a3   :  { %1367 = vst [vmem:[%s1796_s4 + $0x70] sm:$0xff] %v1347_v45   ;;  %v879_v12 = vpop.f32.mrf.mxu2 }
 0x1a8   :  { %v919_v13 = vpop.f32.mrf.mxu3 }
 0x1ab   :  { %v881_v54 = vpop.f32.mrf.mxu2 }
 0x1ac   :  { %v1312_v14 = vpack.c.bf16 %v881_v54, %v879_v12 }
 0x1ae   :  { %1360 = vst [vmem:[%s1796_s4 + $0x38] sm:$0xff] %v1312_v14  }
 0x1b0   :  { %v921_v15 = vpop.f32.mrf.mxu3 }
 0x1b1   :  { %v1352_v17 = vpack.c.bf16 %v921_v15, %v919_v13 }
 0x1b3   :  { %1368 = vst [vmem:[%s1796_s4 + $0x78] sm:$0xff] %v1352_v17   ;;  %v884_v18 = vpop.f32.mrf.mxu2 }
 0x1bb   :  { %v886_v19 = vpop.f32.mrf.mxu2 }
 0x1bc   :  { %v1317_v20 = vpack.c.bf16 %v886_v19, %v884_v18 }
 0x1be   :  { %1361 = vst [vmem:[%s1796_s4 + $0x40] sm:$0xff] %v1317_v20  }
 0x1c3   :  { %v889_v21 = vpop.f32.mrf.mxu2 }
 0x1cb   :  { %v891_v22 = vpop.f32.mrf.mxu2 }
 0x1cc   :  { %v1322_v23 = vpack.c.bf16 %v891_v22, %v889_v21 }
 0x1ce   :  { %1362 = vst [vmem:[%s1796_s4 + $0x48] sm:$0xff] %v1322_v23  }
 0x1d3   :  { %v894_v24 = vpop.f32.mrf.mxu2 }
 0x1db   :  { %v896_v25 = vpop.f32.mrf.mxu2 }
 0x1dc   :  { %v1327_v26 = vpack.c.bf16 %v896_v25, %v894_v24 }
 0x1de   :  { %1363 = vst [vmem:[%s1796_s4 + $0x50] sm:$0xff] %v1327_v26  }
 0x1e3   :  { %v899_v27 = vpop.f32.mrf.mxu2 }
 0x1eb   :  { %v901_v61 = vpop.f32.mrf.mxu2 }
 0x1ec   :  { %v1332_v29 = vpack.c.bf16 %v901_v61, %v899_v27 }
 0x1ee   :  { %1364 = vst [vmem:[%s1796_s4 + $0x58] sm:$0xff] %v1332_v29  }

</bundles_post_ra>
